<compile_context>
chip_gen: v6e
topology: v6e:2x2x1
jax: 0.10.0
libtpu: 0.0.40
codegen_flags: <defaults>
</compile_context>

<pallas_src>
import jax
import jax.numpy as jnp
from jax import lax
from jax.experimental import pallas as pl
from jax.experimental.pallas import tpu as pltpu

# ---------------- args (synthetic, deterministic) ----------------
N_AGENTS = 4
ATTN_EMBED_DIM = 32          # args.attn_embed_dim
ATTN_N_HEADS = 2             # args.attn_n_heads
RNN_HIDDEN_DIM = 32          # args.rnn_hidden_dim
N_ACTIONS = 8                # args.n_actions
INPUT_SHAPE = 16             # per-entity feature dim
HEAD_DIM = ATTN_EMBED_DIM // ATTN_N_HEADS
_COMPUTE_DT = jnp.bfloat16   # MXU operand dtype (accumulation stays f32 everywhere)
# double_attn=0, self_loc=0, repeat_attn=0, use_msg=False


def _round_up(x, m):
    return ((x + m - 1) // m) * m


def _cdiv(a, b):
    return (a + b - 1) // b


# ============ Kernel 1: fc1 + entity attention + fc2 + GRU input-gate precompute ============
def _entity_attn_gi_kernel(ent_ref, pm_ref, em_ref,
                           w1_ref, b1_ref, win_ref, wout_ref, bout_ref,
                           w2_ref, b2_ref, wih_ref, bih_ref,
                           gi_ref):
    D, H, hd, nh = ATTN_EMBED_DIM, RNN_HIDDEN_DIM, HEAD_DIM, ATTN_N_HEADS
    TB, ne = pm_ref.shape[0], pm_ref.shape[1]
    rows = TB * ne
    cdt = _COMPUTE_DT

    # fc1 + ReLU on all TB*ne entity rows (one 2-D matmul).
    x1 = jnp.maximum(
        jnp.dot(ent_ref[...], w1_ref[...], preferred_element_type=jnp.float32) + b1_ref[...],
        0.0)                                                           # (rows, D) f32
    x1c = x1.astype(cdt)

    # Fused q/k/v projection: one (rows,32)@(32,96) matmul instead of 6 per-head ones.
    qkv = jnp.dot(x1c, win_ref[...], preferred_element_type=jnp.float32)   # (rows, 3D) f32
    q3 = qkv[:, 0:D].reshape(TB, ne, D).astype(cdt)        # ne == 8 -> sublane-aligned fold
    k3 = qkv[:, D:2 * D].reshape(TB, ne, D).astype(cdt)
    v3 = qkv[:, 2 * D:3 * D].reshape(TB, ne, D).astype(cdt)

    pmf = pm_ref[...].astype(jnp.float32)                              # (TB, ne, ne), 1.0 == masked
    unmasked = jnp.sum(1.0 - pmf, axis=-1, keepdims=True)              # (TB, ne, 1)
    scale = hd ** -0.5

    head_outs = []
    for h in range(nh):                                                # nh == 2, lane slices of fused qkv
        sl = slice(h * hd, (h + 1) * hd)
        qh, kh, vh = q3[:, :, sl], k3[:, :, sl], v3[:, :, sl]
        logits = jnp.einsum('bqd,bkd->bqk', qh, kh,
                            preferred_element_type=jnp.float32) * scale    # (TB, ne, ne) f32
        # NOTE: logits stay f32 so the -1e30 mask constant is safe.
        logits = jnp.where(pmf > 0.5, -1e30, logits)
        m = jnp.max(logits, axis=-1, keepdims=True)
        p = jnp.exp(logits - m)
        w = p / jnp.sum(p, axis=-1, keepdims=True)
        # rows where every entity is masked: torch softmax gives NaN -> filled with 0
        w = jnp.where(unmasked < 0.5, 0.0, w)
        ah = jnp.einsum('bqk,bkd->bqd', w.astype(cdt), vh,
                        preferred_element_type=jnp.float32)                # (TB, ne, hd)
        head_outs.append(ah.reshape(rows, hd))

    # Fused output projection on the lane-concatenated heads (one matmul instead of 2).
    attn2 = jnp.concatenate(head_outs, axis=-1)                        # (rows, D) f32
    x2 = jnp.dot(attn2.astype(cdt), wout_ref[...],
                 preferred_element_type=jnp.float32) + bout_ref[...]   # (rows, D)

    # post_mask: zero inactive-agent rows before fc2 (non-agent rows are dropped
    # in the wrapper; for agent rows entity_mask[:, :n_agents] == agent_mask).
    em = em_ref[...].astype(jnp.float32)                               # (TB, ne)
    post = jnp.broadcast_to(em[:, :, None], (TB, ne, D)).reshape(rows, D)
    x2 = jnp.where(post > 0.5, 0.0, x2)

    # fc2 + ReLU
    x3 = jnp.maximum(
        jnp.dot(x2.astype(cdt), w2_ref[...], preferred_element_type=jnp.float32) + b2_ref[...],
        0.0)                                                           # (rows, H)
    # GRU input gates (time-parallel half of the GRU, hoisted off the recurrence),
    # emitted in bf16 to halve HBM writeback / kernel-2 read.
    gi = jnp.dot(x3.astype(cdt), wih_ref[...],
                 preferred_element_type=jnp.float32) + bih_ref[...]
    gi_ref[...] = gi.astype(gi_ref.dtype)


def entity_attn_gi(ents_flat, pre_mask, ent_mask, kp, TB):
    Bp, ne, _ = pre_mask.shape
    ed = ents_flat.shape[1]
    D, H, nh = ATTN_EMBED_DIM, RNN_HIDDEN_DIM, ATTN_N_HEADS
    const2 = lambda b: (0, 0)
    flops = 2 * Bp * ne * (ed * D + 3 * D * D + 2 * ne * D + D * D + D * H + H * 3 * H)
    cost = pl.CostEstimate(
        flops=int(flops),
        transcendentals=int(Bp * nh * ne * ne),
        bytes_accessed=int(Bp * (2 * ne * ed + 2 * ne * ne + 4 * ne + 2 * ne * 3 * H)))
    return pl.pallas_call(
        _entity_attn_gi_kernel,
        out_shape=jax.ShapeDtypeStruct((Bp * ne, 3 * H), jnp.bfloat16),
        grid=(Bp // TB,),
        in_specs=[
            pl.BlockSpec((TB * ne, ed), lambda b: (b, 0)),      # entities, bf16
            pl.BlockSpec((TB, ne, ne), lambda b: (b, 0, 0)),    # pre (obs) mask, bf16
            pl.BlockSpec((TB, ne), lambda b: (b, 0)),           # post (entity) mask, f32
            pl.BlockSpec((ed, D), const2),                      # w1
            pl.BlockSpec((1, D), const2),                       # b1
            pl.BlockSpec((D, 3 * D), const2),                   # win  [q|k|v]
            pl.BlockSpec((D, D), const2),                       # wout
            pl.BlockSpec((1, D), const2),                       # bout
            pl.BlockSpec((D, H), const2),                       # w2
            pl.BlockSpec((1, H), const2),                       # b2
            pl.BlockSpec((H, 3 * H), const2),                   # wih
            pl.BlockSpec((1, 3 * H), const2),                   # bih
        ],
        out_specs=pl.BlockSpec((TB * ne, 3 * H), lambda b: (b, 0)),
        compiler_params=pltpu.CompilerParams(dimension_semantics=("parallel",)),
        cost_estimate=cost,
    )(ents_flat, pre_mask, ent_mask,
      kp["w1"], kp["b1"], kp["win"], kp["wout"], kp["bout"],
      kp["w2"], kp["b2"], kp["wih"], kp["bih"])


# ====================== Kernel 2: GRU recurrence (h @ W_hh only) ======================
def _gru_kernel(h0_ref, gi_ref, whh_ref, bhh_ref, hs_ref, h_scr):
    H = RNN_HIDDEN_DIM
    cdt = _COMPUTE_DT
    Tt = gi_ref.shape[0]

    @pl.when(pl.program_id(1) == 0)
    def _():
        h_scr[...] = h0_ref[...]

    def step(i, h):
        # single fused (RB,32)@(32,96) matmul for all three gates (r, z, n)
        gh = jnp.dot(h.astype(cdt), whh_ref[...],
                     preferred_element_type=jnp.float32) + bhh_ref[...]     # (RB, 3H)
        gi = gi_ref[i].astype(jnp.float32)                                  # (RB, 3H)
        r = jax.nn.sigmoid(gi[:, 0:H] + gh[:, 0:H])
        z = jax.nn.sigmoid(gi[:, H:2 * H] + gh[:, H:2 * H])
        n = jnp.tanh(gi[:, 2 * H:3 * H] + r * gh[:, 2 * H:3 * H])
        h_new = (1.0 - z) * n + z * h
        hs_ref[i] = h_new
        return h_new

    h_final = lax.fori_loop(0, Tt, step, h_scr[...], unroll=True)
    h_scr[...] = h_final


def gru_scan(gi_tm, h0, kp, Tt, RB):
    ts_p, Rp, threeH = gi_tm.shape
    H = RNN_HIDDEN_DIM
    const = lambda r, t: (0, 0)
    cost = pl.CostEstimate(
        flops=int(ts_p * Rp * (2 * H * 3 * H + 12 * H)),
        transcendentals=int(ts_p * Rp * 3 * H),
        bytes_accessed=int(ts_p * Rp * (2 * 3 * H + 4 * H)))
    return pl.pallas_call(
        _gru_kernel,
        out_shape=jax.ShapeDtypeStruct((ts_p, Rp, H), jnp.float32),
        grid=(Rp // RB, ts_p // Tt),
        in_specs=[
            pl.BlockSpec((RB, H), lambda r, t: (r, 0)),          # h0
            pl.BlockSpec((Tt, RB, threeH), lambda r, t: (t, r, 0)),   # gi (bf16)
            pl.BlockSpec((H, threeH), const),                    # whh (fused r|z|n)
            pl.BlockSpec((1, threeH), const),                    # bhh
        ],
        out_specs=pl.BlockSpec((Tt, RB, H), lambda r, t: (t, r, 0)),
        scratch_shapes=[pltpu.VMEM((RB, H), jnp.float32)],
        compiler_params=pltpu.CompilerParams(
            dimension_semantics=("parallel", "arbitrary")),
        cost_estimate=cost,
    )(h0, gi_tm, kp["whh"], kp["bhh"])


# ====================== trace-time parameter preparation ======================
def prepare_params(p):
    # NOTE: weights here are stored (in, out); PyTorch nn.Linear / nn.GRUCell store
    # (out, in) and need a transpose when loading real checkpoints.  GRU gate
    # concatenation order is PyTorch's (r, z, n); attention in_trans columns are
    # [q | k | v], head h uses columns [h*hd:(h+1)*hd] of each chunk.
    wdt = _COMPUTE_DT
    return dict(
        w1=p["w1"].astype(wdt), b1=p["b1"],
        win=p["win"].astype(wdt),
        wout=p["wout"].astype(wdt), bout=p["bout"],
        w2=p["w2"].astype(wdt), b2=p["b2"],
        wih=p["wih"].astype(wdt), bih=p["bih"],
        whh=p["whh"].astype(wdt), bhh=p["bhh"],
    )


# ====================== base forward (EntityAttentionRNNAgent.forward) ======================
def agent_forward(entities, obs_mask, entity_mask, hidden_state, params):
    NB, ts, ne, ed = entities.shape
    na, H = N_AGENTS, RNN_HIDDEN_DIM
    assert ne >= na, "agents are assumed to occupy the first n_agents entity slots"
    kp = prepare_params(params)

    # ---- kernel 1: fc1 + attention + fc2 + W_ih gate precompute ----
    B = NB * ts
    # TB: big enough to amortize per-grid-step overhead, but ~ceil(B/2) so the
    # "parallel" axis has >=2 blocks (keeps both v7x TensorCores busy).
    TB = min(256, max(8, _round_up(_cdiv(B, 2), 8)))
    Bp = _round_up(B, TB)

    ents = entities.reshape(B, ne, ed).astype(_COMPUTE_DT)
    om = obs_mask.reshape(B, ne, ne).astype(_COMPUTE_DT)
    em = entity_mask.reshape(B, ne).astype(jnp.float32)
    if Bp != B:
        pad = Bp - B
        ents = jnp.pad(ents, ((0, pad), (0, 0), (0, 0)))
        om = jnp.pad(om, ((0, pad), (0, 0), (0, 0)))
        em = jnp.pad(em, ((0, pad), (0, 0)))

    gi_all = entity_attn_gi(ents.reshape(Bp * ne, ed), om, em, kp, TB)   # (Bp*ne, 3H) bf16

    # ---- kernel 2: sequential GRU over time (agent rows only, time-major) ----
    R = NB * na
    gi = gi_all.reshape(Bp, ne, 3 * H)[:B, :na]                          # (B, na, 3H) bf16
    gi = gi.reshape(NB, ts, na, 3 * H).transpose(1, 0, 2, 3).reshape(ts, R, 3 * H)

    Tt = min(16, ts)
    ts_p = _round_up(ts, Tt)
    # RB ~ ceil(R/2) so the parallel axis has >=2 blocks (v7x); multiple of 16 for bf16 gi.
    RB = min(128, max(16, _round_up(_cdiv(R, 2), 16)))
    Rp = _round_up(R, RB)
    if (ts_p, Rp) != (ts, R):
        gi = jnp.pad(gi, ((0, ts_p - ts), (0, Rp - R), (0, 0)))
    h0 = hidden_state.reshape(R, H).astype(jnp.float32)
    if Rp != R:
        h0 = jnp.pad(h0, ((0, Rp - R), (0, 0)))

    hs_tm = gru_scan(gi, h0, kp, Tt, RB)                                 # (ts_p, Rp, H)
    hs = hs_tm[:ts, :R].reshape(ts, NB, na, H).transpose(1, 0, 2, 3)     # (NB, ts, na, H)

    # ---- fc3 + agent-mask fill: one well-shaped matmul, off the sequential path ----
    q = jnp.einsum("btah,hk->btak", hs, params["w3"]) + params["b3"]
    am = entity_mask.reshape(NB, ts, ne)[:, :, :na].astype(jnp.float32)[..., None]
    q = jnp.where(am > 0.5, 0.0, q)
    return q, hs


# ====================== imagine forward (ImagineEntityAttentionRNNAgent) ======================
def _entitymask2attnmask(m):
    # m: (bs, 1, ne) with 1 == masked.   1 - (1-m) outer (1-m)
    act = 1.0 - m
    return 1.0 - act[..., :, None] * act[..., None, :]                   # (bs, 1, ne, ne)


def imagine_forward(entities, obs_mask, entity_mask, hidden_state, params, key):
    bs, ts, ne, ed = entities.shape
    k_prob, k_bern = jax.random.split(key)

    probs = jnp.broadcast_to(jax.random.uniform(k_prob, (bs, 1, 1)), (bs, 1, ne))
    groupA = jax.random.bernoulli(k_bern, probs).astype(jnp.float32)      # (bs, 1, ne)
    groupB = 1.0 - groupA
    em0 = entity_mask[:, 0:1].astype(jnp.float32)                         # (bs, 1, ne)
    groupA = jnp.clip(groupA + em0, 0.0, 1.0)
    groupB = jnp.clip(groupB + em0, 0.0, 1.0)

    gAatt = _entitymask2attnmask(groupA)
    gBatt = _entitymask2attnmask(groupB)
    interact = jnp.clip((1.0 - gAatt) + (1.0 - gBatt), 0.0, 1.0)          # (bs, 1, ne, ne)
    within = 1.0 - interact
    active = _entitymask2attnmask(em0)
    W_noobs = jnp.clip(within + active, 0.0, 1.0)
    I_noobs = jnp.clip(interact + active, 0.0, 1.0)

    om = obs_mask.astype(jnp.float32)                                     # (bs, ts, ne, ne)
    within_obs = jnp.clip(within + om, 0.0, 1.0)
    interact_obs = jnp.clip(interact + om, 0.0, 1.0)

    entities3 = jnp.concatenate([entities] * 3, axis=0)
    obs_mask3 = jnp.concatenate([om, within_obs, interact_obs], axis=0)
    entity_mask3 = jnp.concatenate([entity_mask] * 3, axis=0)
    hidden3 = jnp.concatenate([hidden_state] * 3, axis=0)

    q, hs = agent_forward(entities3, obs_mask3, entity_mask3, hidden3, params)

    W_rep = jnp.broadcast_to(W_noobs, (bs, ts, ne, ne)).astype(jnp.uint8)
    I_rep = jnp.broadcast_to(I_noobs, (bs, ts, ne, ne)).astype(jnp.uint8)
    return q, hs, (W_rep, I_rep)


# ====================== deterministic parameter init ======================
def init_params(key):
    D, H, A, ed = ATTN_EMBED_DIM, RNN_HIDDEN_DIM, N_ACTIONS, INPUT_SHAPE
    ks = jax.random.split(key, 13)
    w = lambda k, s, sc=0.1: (sc * jax.random.normal(k, s)).astype(jnp.float32)
    return dict(
        w1=w(ks[0], (ed, D)), b1=w(ks[1], (1, D)),
        win=w(ks[2], (D, 3 * D)),                     # attention in_trans (no bias), [q|k|v]
        wout=w(ks[3], (D, D)), bout=w(ks[4], (1, D)),
        w2=w(ks[5], (D, H)), b2=w(ks[6], (1, H)),
        wih=w(ks[7], (H, 3 * H)), whh=w(ks[8], (H, 3 * H)),   # GRU gates in (r, z, n) order
        bih=w(ks[9], (1, 3 * H)), bhh=w(ks[10], (1, 3 * H)),
        w3=w(ks[11], (H, A)), b3=w(ks[12], (1, A)),
    )


if __name__ == "__main__":
    key = jax.random.PRNGKey(0)
    k_ent, k_obs, k_params, k_imag = jax.random.split(key, 4)

    bs, ts, ne, ed = 2, 2, 8, INPUT_SHAPE
    entities = jax.random.normal(k_ent, (bs, ts, ne, ed), jnp.float32)
    obs_mask = (jax.random.uniform(k_obs, (bs, ts, ne, ne)) < 0.2).astype(jnp.uint8)
    entity_mask = jnp.zeros((bs, ts, ne), jnp.uint8).at[:, :, -1].set(1)   # last entity padded
    hidden_state = jnp.zeros((bs, N_AGENTS, RNN_HIDDEN_DIM), jnp.float32)  # init_hidden()
    params = init_params(k_params)

    fwd = jax.jit(imagine_forward)
    q, hs, (Wm, Im) = fwd(entities, obs_mask, entity_mask, hidden_state, params, k_imag)
    jax.block_until_ready((q, hs, Wm, Im))

    assert q.shape == (3 * bs, ts, N_AGENTS, N_ACTIONS)
    assert hs.shape == (3 * bs, ts, N_AGENTS, RNN_HIDDEN_DIM)
    assert Wm.shape == (bs, ts, ne, ne) and Im.shape == (bs, ts, ne, ne)
    print("KERNEL_OK")
</pallas_src>

<mosaic_0001>
module attributes {stable_mosaic.version = 11 : i64} {
  func.func @_gru_kernel(%arg0: i32, %arg1: i32, %arg2: memref<16x32xf32, #tpu.memory_space<vmem>>, %arg3: memref<2x16x96xbf16, #tpu.memory_space<vmem>>, %arg4: memref<32x96xbf16, #tpu.memory_space<vmem>>, %arg5: memref<1x96xf32, #tpu.memory_space<vmem>>, %arg6: memref<2x16x32xf32, #tpu.memory_space<vmem>>, %arg7: memref<16x32xf32, #tpu.memory_space<vmem>>) attributes {dimension_semantics = [#tpu.dimension_semantics<parallel>, #tpu.dimension_semantics<arbitrary>], iteration_bounds = array<i64: 2, 1>, scalar_prefetch = 0 : i64, scratch_operands = 1 : i64, tpu.core_type = #tpu.core_type<tc>, window_params = [{transform_indices = @transform_0, window_bounds = array<i64: 16, 32>}, {transform_indices = @transform_1, window_bounds = array<i64: 2, 16, 96>}, {pipeline_mode = #tpu.pipeline_mode<synchronous>, transform_indices = @transform_2, window_bounds = array<i64: 32, 96>}, {pipeline_mode = #tpu.pipeline_mode<synchronous>, transform_indices = @transform_3, window_bounds = array<i64: 1, 96>}, {transform_indices = @transform_4, window_bounds = array<i64: 2, 16, 32>}]} {
    %c0_i32 = arith.constant 0 : i32
    %0 = arith.cmpi eq, %arg1, %c0_i32 : i32
    %1 = arith.extui %0 : i1 to i32
    %c0_i32_0 = arith.constant 0 : i32
    %2 = arith.cmpi ne, %1, %c0_i32_0 : i32
    scf.if %2 {
      %c0_28 = arith.constant 0 : index
      %c0_29 = arith.constant 0 : index
      %85 = vector.load %arg2[%c0_28, %c0_29] : memref<16x32xf32, #tpu.memory_space<vmem>>, vector<16x32xf32>
      %c0_30 = arith.constant 0 : index
      %c0_31 = arith.constant 0 : index
      %86 = vector.load %arg7[%c0_30, %c0_31] : memref<16x32xf32, #tpu.memory_space<vmem>>, vector<16x32xf32>
      tpu.vector_store %arg7[%c0_30, %c0_31], %85 {strides = array<i32>} : memref<16x32xf32, #tpu.memory_space<vmem>>, vector<16x32xf32>,
    } else {
    }
    %c0 = arith.constant 0 : index
    %c0_1 = arith.constant 0 : index
    %3 = vector.load %arg7[%c0, %c0_1] : memref<16x32xf32, #tpu.memory_space<vmem>>, vector<16x32xf32>
    %c0_i32_2 = arith.constant 0 : i32
    %4 = arith.truncf %3 : vector<16x32xf32> to vector<16x32xbf16>
    %c0_3 = arith.constant 0 : index
    %c0_4 = arith.constant 0 : index
    %5 = vector.load %arg4[%c0_3, %c0_4] : memref<32x96xbf16, #tpu.memory_space<vmem>>, vector<32x96xbf16>
    %cst = arith.constant dense<0.000000e+00> : vector<16x96xf32>
    %6 = tpu.matmul %4, %5, %cst {dimension_numbers = #tpu.dot_dimension_numbers<[1], [0], [0], [1], [0, 0, 1, 1], [], []>} : vector<16x32xbf16>, vector<32x96xbf16>, vector<16x96xf32> -> vector<16x96xf32>
    %c0_5 = arith.constant 0 : index
    %c0_6 = arith.constant 0 : index
    %7 = vector.load %arg5[%c0_5, %c0_6] : memref<1x96xf32, #tpu.memory_space<vmem>>, vector<1x96xf32>
    %8 = vector.broadcast %7 : vector<1x96xf32> to vector<16x96xf32>
    %9 = arith.addf %6, %8 : vector<16x96xf32>
    %10 = arith.index_cast %c0_i32_2 : i32 to index
    %c0_7 = arith.constant 0 : index
    %c0_8 = arith.constant 0 : index
    %11 = vector.load %arg3[%10, %c0_7, %c0_8] : memref<2x16x96xbf16, #tpu.memory_space<vmem>>, vector<1x16x96xbf16>
    %12 = vector.shape_cast %11 : vector<1x16x96xbf16> to vector<16x96xbf16>
    %13 = arith.extf %12 : vector<16x96xbf16> to vector<16x96xf32>
    %14 = vector.extract_strided_slice %13 {offsets = [0, 0], sizes = [16, 32], strides = [1, 1]} : vector<16x96xf32> to vector<16x32xf32>
    %15 = vector.extract_strided_slice %9 {offsets = [0, 0], sizes = [16, 32], strides = [1, 1]} : vector<16x96xf32> to vector<16x32xf32>
    %16 = arith.addf %14, %15 : vector<16x32xf32>
    %17 = arith.negf %16 : vector<16x32xf32>
    %18 = math.exp %17 : vector<16x32xf32>
    %cst_9 = arith.constant 1.000000e+00 : f32
    %19 = vector.broadcast %cst_9 : f32 to vector<16x32xf32>
    %20 = arith.addf %19, %18 : vector<16x32xf32>
    %21 = arith.divf %19, %20 : vector<16x32xf32>
    %22 = vector.extract_strided_slice %13 {offsets = [0, 32], sizes = [16, 32], strides = [1, 1]} : vector<16x96xf32> to vector<16x32xf32>
    %23 = vector.extract_strided_slice %9 {offsets = [0, 32], sizes = [16, 32], strides = [1, 1]} : vector<16x96xf32> to vector<16x32xf32>
    %24 = arith.addf %22, %23 : vector<16x32xf32>
    %25 = arith.negf %24 : vector<16x32xf32>
    %26 = math.exp %25 : vector<16x32xf32>
    %cst_10 = arith.constant 1.000000e+00 : f32
    %27 = vector.broadcast %cst_10 : f32 to vector<16x32xf32>
    %28 = arith.addf %27, %26 : vector<16x32xf32>
    %29 = arith.divf %27, %28 : vector<16x32xf32>
    %30 = vector.extract_strided_slice %13 {offsets = [0, 64], sizes = [16, 32], strides = [1, 1]} : vector<16x96xf32> to vector<16x32xf32>
    %31 = vector.extract_strided_slice %9 {offsets = [0, 64], sizes = [16, 32], strides = [1, 1]} : vector<16x96xf32> to vector<16x32xf32>
    %32 = arith.mulf %21, %31 : vector<16x32xf32>
    %33 = arith.addf %30, %32 : vector<16x32xf32>
    %34 = math.tanh %33 : vector<16x32xf32>
    %cst_11 = arith.constant 1.000000e+00 : f32
    %35 = vector.broadcast %cst_11 : f32 to vector<16x32xf32>
    %36 = arith.subf %35, %29 : vector<16x32xf32>
    %37 = arith.mulf %36, %34 : vector<16x32xf32>
    %38 = arith.mulf %29, %3 : vector<16x32xf32>
    %39 = arith.addf %37, %38 : vector<16x32xf32>
    %40 = arith.index_cast %c0_i32_2 : i32 to index
    %c0_12 = arith.constant 0 : index
    %c0_13 = arith.constant 0 : index
    %41 = vector.load %arg6[%40, %c0_12, %c0_13] : memref<2x16x32xf32, #tpu.memory_space<vmem>>, vector<1x16x32xf32>
    %42 = vector.shape_cast %41 : vector<1x16x32xf32> to vector<16x32xf32>
    %43 = vector.shape_cast %39 : vector<16x32xf32> to vector<1x16x32xf32>
    tpu.vector_store %arg6[%40, %c0_12, %c0_13], %43 {strides = array<i32>} : memref<2x16x32xf32, #tpu.memory_space<vmem>>, vector<1x16x32xf32>,
    %c1_i32 = arith.constant 1 : i32
    %44 = arith.truncf %39 : vector<16x32xf32> to vector<16x32xbf16>
    %c0_14 = arith.constant 0 : index
    %c0_15 = arith.constant 0 : index
    %45 = vector.load %arg4[%c0_14, %c0_15] : memref<32x96xbf16, #tpu.memory_space<vmem>>, vector<32x96xbf16>
    %cst_16 = arith.constant dense<0.000000e+00> : vector<16x96xf32>
    %46 = tpu.matmul %44, %45, %cst_16 {dimension_numbers = #tpu.dot_dimension_numbers<[1], [0], [0], [1], [0, 0, 1, 1], [], []>} : vector<16x32xbf16>, vector<32x96xbf16>, vector<16x96xf32> -> vector<16x96xf32>
    %c0_17 = arith.constant 0 : index
    %c0_18 = arith.constant 0 : index
    %47 = vector.load %arg5[%c0_17, %c0_18] : memref<1x96xf32, #tpu.memory_space<vmem>>, vector<1x96xf32>
    %48 = vector.broadcast %47 : vector<1x96xf32> to vector<16x96xf32>
    %49 = arith.addf %46, %48 : vector<16x96xf32>
    %50 = arith.index_cast %c1_i32 : i32 to index
    %c0_19 = arith.constant 0 : index
    %c0_20 = arith.constant 0 : index
    %51 = vector.load %arg3[%50, %c0_19, %c0_20] : memref<2x16x96xbf16, #tpu.memory_space<vmem>>, vector<1x16x96xbf16>
    %52 = vector.shape_cast %51 : vector<1x16x96xbf16> to vector<16x96xbf16>
    %53 = arith.extf %52 : vector<16x96xbf16> to vector<16x96xf32>
    %54 = vector.extract_strided_slice %53 {offsets = [0, 0], sizes = [16, 32], strides = [1, 1]} : vector<16x96xf32> to vector<16x32xf32>
    %55 = vector.extract_strided_slice %49 {offsets = [0, 0], sizes = [16, 32], strides = [1, 1]} : vector<16x96xf32> to vector<16x32xf32>
    %56 = arith.addf %54, %55 : vector<16x32xf32>
    %57 = arith.negf %56 : vector<16x32xf32>
    %58 = math.exp %57 : vector<16x32xf32>
    %cst_21 = arith.constant 1.000000e+00 : f32
    %59 = vector.broadcast %cst_21 : f32 to vector<16x32xf32>
    %60 = arith.addf %59, %58 : vector<16x32xf32>
    %61 = arith.divf %59, %60 : vector<16x32xf32>
    %62 = vector.extract_strided_slice %53 {offsets = [0, 32], sizes = [16, 32], strides = [1, 1]} : vector<16x96xf32> to vector<16x32xf32>
    %63 = vector.extract_strided_slice %49 {offsets = [0, 32], sizes = [16, 32], strides = [1, 1]} : vector<16x96xf32> to vector<16x32xf32>
    %64 = arith.addf %62, %63 : vector<16x32xf32>
    %65 = arith.negf %64 : vector<16x32xf32>
    %66 = math.exp %65 : vector<16x32xf32>
    %cst_22 = arith.constant 1.000000e+00 : f32
    %67 = vector.broadcast %cst_22 : f32 to vector<16x32xf32>
    %68 = arith.addf %67, %66 : vector<16x32xf32>
    %69 = arith.divf %67, %68 : vector<16x32xf32>
    %70 = vector.extract_strided_slice %53 {offsets = [0, 64], sizes = [16, 32], strides = [1, 1]} : vector<16x96xf32> to vector<16x32xf32>
    %71 = vector.extract_strided_slice %49 {offsets = [0, 64], sizes = [16, 32], strides = [1, 1]} : vector<16x96xf32> to vector<16x32xf32>
    %72 = arith.mulf %61, %71 : vector<16x32xf32>
    %73 = arith.addf %70, %72 : vector<16x32xf32>
    %74 = math.tanh %73 : vector<16x32xf32>
    %cst_23 = arith.constant 1.000000e+00 : f32
    %75 = vector.broadcast %cst_23 : f32 to vector<16x32xf32>
    %76 = arith.subf %75, %69 : vector<16x32xf32>
    %77 = arith.mulf %76, %74 : vector<16x32xf32>
    %78 = arith.mulf %69, %39 : vector<16x32xf32>
    %79 = arith.addf %77, %78 : vector<16x32xf32>
    %80 = arith.index_cast %c1_i32 : i32 to index
    %c0_24 = arith.constant 0 : index
    %c0_25 = arith.constant 0 : index
    %81 = vector.load %arg6[%80, %c0_24, %c0_25] : memref<2x16x32xf32, #tpu.memory_space<vmem>>, vector<1x16x32xf32>
    %82 = vector.shape_cast %81 : vector<1x16x32xf32> to vector<16x32xf32>
    %83 = vector.shape_cast %79 : vector<16x32xf32> to vector<1x16x32xf32>
    tpu.vector_store %arg6[%80, %c0_24, %c0_25], %83 {strides = array<i32>} : memref<2x16x32xf32, #tpu.memory_space<vmem>>, vector<1x16x32xf32>,
    %c2_i32 = arith.constant 2 : i32
    %c0_26 = arith.constant 0 : index
    %c0_27 = arith.constant 0 : index
    %84 = vector.load %arg7[%c0_26, %c0_27] : memref<16x32xf32, #tpu.memory_space<vmem>>, vector<16x32xf32>
    tpu.vector_store %arg7[%c0_26, %c0_27], %79 {strides = array<i32>} : memref<16x32xf32, #tpu.memory_space<vmem>>, vector<16x32xf32>,
    return
  }
  func.func @transform_0(%arg0: i32, %arg1: i32) -> (i32, i32) {
    %c0_i32 = arith.constant 0 : i32
    %c0_i32_0 = arith.constant 0 : i32
    return %arg0, %c0_i32 : i32, i32
  }
  func.func @transform_1(%arg0: i32, %arg1: i32) -> (i32, i32, i32) {
    %c0_i32 = arith.constant 0 : i32
    %c0_i32_0 = arith.constant 0 : i32
    return %arg1, %arg0, %c0_i32 : i32, i32, i32
  }
  func.func @transform_2(%arg0: i32, %arg1: i32) -> (i32, i32) {
    %c0_i32 = arith.constant 0 : i32
    %c0_i32_0 = arith.constant 0 : i32
    %c0_i32_1 = arith.constant 0 : i32
    return %c0_i32, %c0_i32_0 : i32, i32
  }
  func.func @transform_3(%arg0: i32, %arg1: i32) -> (i32, i32) {
    %c0_i32 = arith.constant 0 : i32
    %c0_i32_0 = arith.constant 0 : i32
    %c0_i32_1 = arith.constant 0 : i32
    return %c0_i32, %c0_i32_0 : i32, i32
  }
  func.func @transform_4(%arg0: i32, %arg1: i32) -> (i32, i32, i32) {
    %c0_i32 = arith.constant 0 : i32
    %c0_i32_0 = arith.constant 0 : i32
    return %arg1, %arg0, %c0_i32 : i32, i32, i32
  }
}

module attributes {stable_mosaic.version = 11 : i64} {
  func.func @_entity_attn_gi_kernel(%arg0: i32, %arg1: memref<64x16xbf16, #tpu.memory_space<vmem>>, %arg2: memref<8x8x8xbf16, #tpu.memory_space<vmem>>, %arg3: memref<8x8xf32, #tpu.memory_space<vmem>>, %arg4: memref<16x32xbf16, #tpu.memory_space<vmem>>, %arg5: memref<1x32xf32, #tpu.memory_space<vmem>>, %arg6: memref<32x96xbf16, #tpu.memory_space<vmem>>, %arg7: memref<32x32xbf16, #tpu.memory_space<vmem>>, %arg8: memref<1x32xf32, #tpu.memory_space<vmem>>, %arg9: memref<32x32xbf16, #tpu.memory_space<vmem>>, %arg10: memref<1x32xf32, #tpu.memory_space<vmem>>, %arg11: memref<32x96xbf16, #tpu.memory_space<vmem>>, %arg12: memref<1x96xf32, #tpu.memory_space<vmem>>, %arg13: memref<64x96xbf16, #tpu.memory_space<vmem>>) attributes {dimension_semantics = [#tpu.dimension_semantics<parallel>], iteration_bounds = array<i64: 2>, scalar_prefetch = 0 : i64, scratch_operands = 0 : i64, tpu.core_type = #tpu.core_type<tc>, window_params = [{transform_indices = @transform_0, window_bounds = array<i64: 64, 16>}, {transform_indices = @transform_1, window_bounds = array<i64: 8, 8, 8>}, {transform_indices = @transform_2, window_bounds = array<i64: 8, 8>}, {pipeline_mode = #tpu.pipeline_mode<synchronous>, transform_indices = @transform_3, window_bounds = array<i64: 16, 32>}, {pipeline_mode = #tpu.pipeline_mode<synchronous>, transform_indices = @transform_4, window_bounds = array<i64: 1, 32>}, {pipeline_mode = #tpu.pipeline_mode<synchronous>, transform_indices = @transform_5, window_bounds = array<i64: 32, 96>}, {pipeline_mode = #tpu.pipeline_mode<synchronous>, transform_indices = @transform_6, window_bounds = array<i64: 32, 32>}, {pipeline_mode = #tpu.pipeline_mode<synchronous>, transform_indices = @transform_7, window_bounds = array<i64: 1, 32>}, {pipeline_mode = #tpu.pipeline_mode<synchronous>, transform_indices = @transform_8, window_bounds = array<i64: 32, 32>}, {pipeline_mode = #tpu.pipeline_mode<synchronous>, transform_indices = @transform_9, window_bounds = array<i64: 1, 32>}, {pipeline_mode = #tpu.pipeline_mode<synchronous>, transform_indices = @transform_10, window_bounds = array<i64: 32, 96>}, {pipeline_mode = #tpu.pipeline_mode<synchronous>, transform_indices = @transform_11, window_bounds = array<i64: 1, 96>}, {transform_indices = @transform_12, window_bounds = array<i64: 64, 96>}]} {
    %c0 = arith.constant 0 : index
    %c0_0 = arith.constant 0 : index
    %0 = vector.load %arg1[%c0, %c0_0] : memref<64x16xbf16, #tpu.memory_space<vmem>>, vector<64x16xbf16>
    %c0_1 = arith.constant 0 : index
    %c0_2 = arith.constant 0 : index
    %1 = vector.load %arg4[%c0_1, %c0_2] : memref<16x32xbf16, #tpu.memory_space<vmem>>, vector<16x32xbf16>
    %cst = arith.constant dense<0.000000e+00> : vector<64x32xf32>
    %2 = tpu.matmul %0, %1, %cst {dimension_numbers = #tpu.dot_dimension_numbers<[1], [0], [0], [1], [0, 0, 1, 1], [], []>} : vector<64x16xbf16>, vector<16x32xbf16>, vector<64x32xf32> -> vector<64x32xf32>
    %c0_3 = arith.constant 0 : index
    %c0_4 = arith.constant 0 : index
    %3 = vector.load %arg5[%c0_3, %c0_4] : memref<1x32xf32, #tpu.memory_space<vmem>>, vector<1x32xf32>
    %4 = vector.broadcast %3 : vector<1x32xf32> to vector<64x32xf32>
    %5 = arith.addf %2, %4 : vector<64x32xf32>
    %cst_5 = arith.constant 0.000000e+00 : f32
    %6 = vector.broadcast %cst_5 : f32 to vector<64x32xf32>
    %7 = arith.maximumf %5, %6 : vector<64x32xf32>
    %8 = arith.truncf %7 : vector<64x32xf32> to vector<64x32xbf16>
    %c0_6 = arith.constant 0 : index
    %c0_7 = arith.constant 0 : index
    %9 = vector.load %arg6[%c0_6, %c0_7] : memref<32x96xbf16, #tpu.memory_space<vmem>>, vector<32x96xbf16>
    %cst_8 = arith.constant dense<0.000000e+00> : vector<64x96xf32>
    %10 = tpu.matmul %8, %9, %cst_8 {dimension_numbers = #tpu.dot_dimension_numbers<[1], [0], [0], [1], [0, 0, 1, 1], [], []>} : vector<64x32xbf16>, vector<32x96xbf16>, vector<64x96xf32> -> vector<64x96xf32>
    %11 = vector.extract_strided_slice %10 {offsets = [0, 0], sizes = [64, 32], strides = [1, 1]} : vector<64x96xf32> to vector<64x32xf32>
    %12 = vector.shape_cast %11 : vector<64x32xf32> to vector<8x8x32xf32>
    %13 = arith.truncf %12 : vector<8x8x32xf32> to vector<8x8x32xbf16>
    %14 = vector.extract_strided_slice %10 {offsets = [0, 32], sizes = [64, 32], strides = [1, 1]} : vector<64x96xf32> to vector<64x32xf32>
    %15 = vector.shape_cast %14 : vector<64x32xf32> to vector<8x8x32xf32>
    %16 = arith.truncf %15 : vector<8x8x32xf32> to vector<8x8x32xbf16>
    %17 = vector.extract_strided_slice %10 {offsets = [0, 64], sizes = [64, 32], strides = [1, 1]} : vector<64x96xf32> to vector<64x32xf32>
    %18 = vector.shape_cast %17 : vector<64x32xf32> to vector<8x8x32xf32>
    %19 = arith.truncf %18 : vector<8x8x32xf32> to vector<8x8x32xbf16>
    %c0_9 = arith.constant 0 : index
    %c0_10 = arith.constant 0 : index
    %c0_11 = arith.constant 0 : index
    %20 = vector.load %arg2[%c0_9, %c0_10, %c0_11] : memref<8x8x8xbf16, #tpu.memory_space<vmem>>, vector<8x8x8xbf16>
    %21 = arith.extf %20 : vector<8x8x8xbf16> to vector<8x8x8xf32>
    %cst_12 = arith.constant 1.000000e+00 : f32
    %22 = vector.broadcast %cst_12 : f32 to vector<8x8x8xf32>
    %23 = arith.subf %22, %21 : vector<8x8x8xf32>
    %cst_13 = arith.constant dense<0.000000e+00> : vector<8x8xf32>
    %24 = vector.multi_reduction <add>, %23, %cst_13 [2] : vector<8x8x8xf32> to vector<8x8xf32>
    %25 = vector.shape_cast %24 : vector<8x8xf32> to vector<8x8x1xf32>
    %26 = vector.extract_strided_slice %13 {offsets = [0, 0, 0], sizes = [8, 8, 16], strides = [1, 1, 1]} : vector<8x8x32xbf16> to vector<8x8x16xbf16>
    %27 = vector.extract_strided_slice %16 {offsets = [0, 0, 0], sizes = [8, 8, 16], strides = [1, 1, 1]} : vector<8x8x32xbf16> to vector<8x8x16xbf16>
    %28 = vector.extract_strided_slice %19 {offsets = [0, 0, 0], sizes = [8, 8, 16], strides = [1, 1, 1]} : vector<8x8x32xbf16> to vector<8x8x16xbf16>
    "tpu.trace_start"() <{level = 10 : i32, message = "bqd,bkd->bqk"}> : () -> ()
    %cst_14 = arith.constant dense<0.000000e+00> : vector<8x8x8xf32>
    %29 = tpu.matmul %26, %27, %cst_14 {dimension_numbers = #tpu.dot_dimension_numbers<[2], [2], [1], [1], [0, 0, 0, 1, 1, 1], [0], [0]>} : vector<8x8x16xbf16>, vector<8x8x16xbf16>, vector<8x8x8xf32> -> vector<8x8x8xf32>
    "tpu.trace_stop"() : () -> ()
    %cst_15 = arith.constant 2.500000e-01 : f32
    %30 = vector.broadcast %cst_15 : f32 to vector<8x8x8xf32>
    %31 = arith.mulf %29, %30 : vector<8x8x8xf32>
    %cst_16 = arith.constant 5.000000e-01 : f32
    %32 = vector.broadcast %cst_16 : f32 to vector<8x8x8xf32>
    %33 = arith.cmpf ogt, %21, %32 : vector<8x8x8xf32>
    %cst_17 = arith.constant -1.000000e+30 : f32
    %34 = vector.broadcast %cst_17 : f32 to vector<8x8x8xf32>
    %35 = arith.select %33, %34, %31 : vector<8x8x8xi1>, vector<8x8x8xf32>
    %cst_18 = arith.constant dense<0xFF800000> : vector<8x8xf32>
    %36 = vector.multi_reduction <maximumf>, %35, %cst_18 [2] : vector<8x8x8xf32> to vector<8x8xf32>
    %37 = vector.shape_cast %36 : vector<8x8xf32> to vector<8x8x1xf32>
    %38 = vector.broadcast %37 : vector<8x8x1xf32> to vector<8x8x8xf32>
    %39 = arith.subf %35, %38 : vector<8x8x8xf32>
    %40 = math.exp %39 : vector<8x8x8xf32>
    %cst_19 = arith.constant dense<0.000000e+00> : vector<8x8xf32>
    %41 = vector.multi_reduction <add>, %40, %cst_19 [2] : vector<8x8x8xf32> to vector<8x8xf32>
    %42 = vector.shape_cast %41 : vector<8x8xf32> to vector<8x8x1xf32>
    %43 = vector.broadcast %42 : vector<8x8x1xf32> to vector<8x8x8xf32>
    %44 = arith.divf %40, %43 : vector<8x8x8xf32>
    %cst_20 = arith.constant 5.000000e-01 : f32
    %45 = vector.broadcast %cst_20 : f32 to vector<8x8x1xf32>
    %46 = arith.cmpf olt, %25, %45 : vector<8x8x1xf32>
    %cst_21 = arith.constant 0.000000e+00 : f32
    %47 = vector.shape_cast %46 : vector<8x8x1xi1> to vector<8x8x1xi1>
    %48 = vector.broadcast %47 : vector<8x8x1xi1> to vector<8x8x8xi1>
    %49 = vector.broadcast %cst_21 : f32 to vector<8x8x8xf32>
    %50 = arith.select %48, %49, %44 : vector<8x8x8xi1>, vector<8x8x8xf32>
    %51 = arith.truncf %50 : vector<8x8x8xf32> to vector<8x8x8xbf16>
    "tpu.trace_start"() <{level = 10 : i32, message = "bqk,bkd->bqd"}> : () -> ()
    %cst_22 = arith.constant dense<0.000000e+00> : vector<8x8x16xf32>
    %52 = tpu.matmul %51, %28, %cst_22 {dimension_numbers = #tpu.dot_dimension_numbers<[2], [1], [1], [2], [0, 0, 0, 1, 1, 2], [0], [0]>} : vector<8x8x8xbf16>, vector<8x8x16xbf16>, vector<8x8x16xf32> -> vector<8x8x16xf32>
    "tpu.trace_stop"() : () -> ()
    %53 = vector.shape_cast %52 : vector<8x8x16xf32> to vector<64x16xf32>
    %54 = vector.extract_strided_slice %13 {offsets = [0, 0, 16], sizes = [8, 8, 16], strides = [1, 1, 1]} : vector<8x8x32xbf16> to vector<8x8x16xbf16>
    %55 = vector.extract_strided_slice %16 {offsets = [0, 0, 16], sizes = [8, 8, 16], strides = [1, 1, 1]} : vector<8x8x32xbf16> to vector<8x8x16xbf16>
    %56 = vector.extract_strided_slice %19 {offsets = [0, 0, 16], sizes = [8, 8, 16], strides = [1, 1, 1]} : vector<8x8x32xbf16> to vector<8x8x16xbf16>
    "tpu.trace_start"() <{level = 10 : i32, message = "bqd,bkd->bqk"}> : () -> ()
    %cst_23 = arith.constant dense<0.000000e+00> : vector<8x8x8xf32>
    %57 = tpu.matmul %54, %55, %cst_23 {dimension_numbers = #tpu.dot_dimension_numbers<[2], [2], [1], [1], [0, 0, 0, 1, 1, 1], [0], [0]>} : vector<8x8x16xbf16>, vector<8x8x16xbf16>, vector<8x8x8xf32> -> vector<8x8x8xf32>
    "tpu.trace_stop"() : () -> ()
    %cst_24 = arith.constant 2.500000e-01 : f32
    %58 = vector.broadcast %cst_24 : f32 to vector<8x8x8xf32>
    %59 = arith.mulf %57, %58 : vector<8x8x8xf32>
    %cst_25 = arith.constant 5.000000e-01 : f32
    %60 = vector.broadcast %cst_25 : f32 to vector<8x8x8xf32>
    %61 = arith.cmpf ogt, %21, %60 : vector<8x8x8xf32>
    %cst_26 = arith.constant -1.000000e+30 : f32
    %62 = vector.broadcast %cst_26 : f32 to vector<8x8x8xf32>
    %63 = arith.select %61, %62, %59 : vector<8x8x8xi1>, vector<8x8x8xf32>
    %cst_27 = arith.constant dense<0xFF800000> : vector<8x8xf32>
    %64 = vector.multi_reduction <maximumf>, %63, %cst_27 [2] : vector<8x8x8xf32> to vector<8x8xf32>
    %65 = vector.shape_cast %64 : vector<8x8xf32> to vector<8x8x1xf32>
    %66 = vector.broadcast %65 : vector<8x8x1xf32> to vector<8x8x8xf32>
    %67 = arith.subf %63, %66 : vector<8x8x8xf32>
    %68 = math.exp %67 : vector<8x8x8xf32>
    %cst_28 = arith.constant dense<0.000000e+00> : vector<8x8xf32>
    %69 = vector.multi_reduction <add>, %68, %cst_28 [2] : vector<8x8x8xf32> to vector<8x8xf32>
    %70 = vector.shape_cast %69 : vector<8x8xf32> to vector<8x8x1xf32>
    %71 = vector.broadcast %70 : vector<8x8x1xf32> to vector<8x8x8xf32>
    %72 = arith.divf %68, %71 : vector<8x8x8xf32>
    %cst_29 = arith.constant 5.000000e-01 : f32
    %73 = vector.broadcast %cst_29 : f32 to vector<8x8x1xf32>
    %74 = arith.cmpf olt, %25, %73 : vector<8x8x1xf32>
    %cst_30 = arith.constant 0.000000e+00 : f32
    %75 = vector.shape_cast %74 : vector<8x8x1xi1> to vector<8x8x1xi1>
    %76 = vector.broadcast %75 : vector<8x8x1xi1> to vector<8x8x8xi1>
    %77 = vector.broadcast %cst_30 : f32 to vector<8x8x8xf32>
    %78 = arith.select %76, %77, %72 : vector<8x8x8xi1>, vector<8x8x8xf32>
    %79 = arith.truncf %78 : vector<8x8x8xf32> to vector<8x8x8xbf16>
    "tpu.trace_start"() <{level = 10 : i32, message = "bqk,bkd->bqd"}> : () -> ()
    %cst_31 = arith.constant dense<0.000000e+00> : vector<8x8x16xf32>
    %80 = tpu.matmul %79, %56, %cst_31 {dimension_numbers = #tpu.dot_dimension_numbers<[2], [1], [1], [2], [0, 0, 0, 1, 1, 2], [0], [0]>} : vector<8x8x8xbf16>, vector<8x8x16xbf16>, vector<8x8x16xf32> -> vector<8x8x16xf32>
    "tpu.trace_stop"() : () -> ()
    %81 = vector.shape_cast %80 : vector<8x8x16xf32> to vector<64x16xf32>
    %82 = tpu.concatenate %53, %81 in 1 : vector<64x16xf32>, vector<64x16xf32> -> vector<64x32xf32>
    %83 = arith.truncf %82 : vector<64x32xf32> to vector<64x32xbf16>
    %c0_32 = arith.constant 0 : index
    %c0_33 = arith.constant 0 : index
    %84 = vector.load %arg7[%c0_32, %c0_33] : memref<32x32xbf16, #tpu.memory_space<vmem>>, vector<32x32xbf16>
    %cst_34 = arith.constant dense<0.000000e+00> : vector<64x32xf32>
    %85 = tpu.matmul %83, %84, %cst_34 {dimension_numbers = #tpu.dot_dimension_numbers<[1], [0], [0], [1], [0, 0, 1, 1], [], []>} : vector<64x32xbf16>, vector<32x32xbf16>, vector<64x32xf32> -> vector<64x32xf32>
    %c0_35 = arith.constant 0 : index
    %c0_36 = arith.constant 0 : index
    %86 = vector.load %arg8[%c0_35, %c0_36] : memref<1x32xf32, #tpu.memory_space<vmem>>, vector<1x32xf32>
    %87 = vector.broadcast %86 : vector<1x32xf32> to vector<64x32xf32>
    %88 = arith.addf %85, %87 : vector<64x32xf32>
    %c0_37 = arith.constant 0 : index
    %c0_38 = arith.constant 0 : index
    %89 = vector.load %arg3[%c0_37, %c0_38] : memref<8x8xf32, #tpu.memory_space<vmem>>, vector<8x8xf32>
    %90 = vector.shape_cast %89 : vector<8x8xf32> to vector<8x8x1xf32>
    %91 = vector.shape_cast %90 : vector<8x8x1xf32> to vector<8x8x1xf32>
    %92 = vector.broadcast %91 : vector<8x8x1xf32> to vector<8x8x32xf32>
    %93 = vector.shape_cast %92 : vector<8x8x32xf32> to vector<64x32xf32>
    %cst_39 = arith.constant 5.000000e-01 : f32
    %94 = vector.broadcast %cst_39 : f32 to vector<64x32xf32>
    %95 = arith.cmpf ogt, %93, %94 : vector<64x32xf32>
    %cst_40 = arith.constant 0.000000e+00 : f32
    %96 = vector.broadcast %cst_40 : f32 to vector<64x32xf32>
    %97 = arith.select %95, %96, %88 : vector<64x32xi1>, vector<64x32xf32>
    %98 = arith.truncf %97 : vector<64x32xf32> to vector<64x32xbf16>
    %c0_41 = arith.constant 0 : index
    %c0_42 = arith.constant 0 : index
    %99 = vector.load %arg9[%c0_41, %c0_42] : memref<32x32xbf16, #tpu.memory_space<vmem>>, vector<32x32xbf16>
    %cst_43 = arith.constant dense<0.000000e+00> : vector<64x32xf32>
    %100 = tpu.matmul %98, %99, %cst_43 {dimension_numbers = #tpu.dot_dimension_numbers<[1], [0], [0], [1], [0, 0, 1, 1], [], []>} : vector<64x32xbf16>, vector<32x32xbf16>, vector<64x32xf32> -> vector<64x32xf32>
    %c0_44 = arith.constant 0 : index
    %c0_45 = arith.constant 0 : index
    %101 = vector.load %arg10[%c0_44, %c0_45] : memref<1x32xf32, #tpu.memory_space<vmem>>, vector<1x32xf32>
    %102 = vector.broadcast %101 : vector<1x32xf32> to vector<64x32xf32>
    %103 = arith.addf %100, %102 : vector<64x32xf32>
    %cst_46 = arith.constant 0.000000e+00 : f32
    %104 = vector.broadcast %cst_46 : f32 to vector<64x32xf32>
    %105 = arith.maximumf %103, %104 : vector<64x32xf32>
    %106 = arith.truncf %105 : vector<64x32xf32> to vector<64x32xbf16>
    %c0_47 = arith.constant 0 : index
    %c0_48 = arith.constant 0 : index
    %107 = vector.load %arg11[%c0_47, %c0_48] : memref<32x96xbf16, #tpu.memory_space<vmem>>, vector<32x96xbf16>
    %cst_49 = arith.constant dense<0.000000e+00> : vector<64x96xf32>
    %108 = tpu.matmul %106, %107, %cst_49 {dimension_numbers = #tpu.dot_dimension_numbers<[1], [0], [0], [1], [0, 0, 1, 1], [], []>} : vector<64x32xbf16>, vector<32x96xbf16>, vector<64x96xf32> -> vector<64x96xf32>
    %c0_50 = arith.constant 0 : index
    %c0_51 = arith.constant 0 : index
    %109 = vector.load %arg12[%c0_50, %c0_51] : memref<1x96xf32, #tpu.memory_space<vmem>>, vector<1x96xf32>
    %110 = vector.broadcast %109 : vector<1x96xf32> to vector<64x96xf32>
    %111 = arith.addf %108, %110 : vector<64x96xf32>
    %112 = arith.truncf %111 : vector<64x96xf32> to vector<64x96xbf16>
    %c0_52 = arith.constant 0 : index
    %c0_53 = arith.constant 0 : index
    %113 = vector.load %arg13[%c0_52, %c0_53] : memref<64x96xbf16, #tpu.memory_space<vmem>>, vector<64x96xbf16>
    tpu.vector_store %arg13[%c0_52, %c0_53], %112 {strides = array<i32>} : memref<64x96xbf16, #tpu.memory_space<vmem>>, vector<64x96xbf16>,
    return
  }
  func.func @transform_0(%arg0: i32) -> (i32, i32) {
    %c0_i32 = arith.constant 0 : i32
    %c0_i32_0 = arith.constant 0 : i32
    return %arg0, %c0_i32 : i32, i32
  }
  func.func @transform_1(%arg0: i32) -> (i32, i32, i32) {
    %c0_i32 = arith.constant 0 : i32
    %c0_i32_0 = arith.constant 0 : i32
    %c0_i32_1 = arith.constant 0 : i32
    return %arg0, %c0_i32, %c0_i32_0 : i32, i32, i32
  }
  func.func @transform_2(%arg0: i32) -> (i32, i32) {
    %c0_i32 = arith.constant 0 : i32
    %c0_i32_0 = arith.constant 0 : i32
    return %arg0, %c0_i32 : i32, i32
  }
  func.func @transform_3(%arg0: i32) -> (i32, i32) {
    %c0_i32 = arith.constant 0 : i32
    %c0_i32_0 = arith.constant 0 : i32
    %c0_i32_1 = arith.constant 0 : i32
    return %c0_i32, %c0_i32_0 : i32, i32
  }
  func.func @transform_4(%arg0: i32) -> (i32, i32) {
    %c0_i32 = arith.constant 0 : i32
    %c0_i32_0 = arith.constant 0 : i32
    %c0_i32_1 = arith.constant 0 : i32
    return %c0_i32, %c0_i32_0 : i32, i32
  }
  func.func @transform_5(%arg0: i32) -> (i32, i32) {
    %c0_i32 = arith.constant 0 : i32
    %c0_i32_0 = arith.constant 0 : i32
    %c0_i32_1 = arith.constant 0 : i32
    return %c0_i32, %c0_i32_0 : i32, i32
  }
  func.func @transform_6(%arg0: i32) -> (i32, i32) {
    %c0_i32 = arith.constant 0 : i32
    %c0_i32_0 = arith.constant 0 : i32
    %c0_i32_1 = arith.constant 0 : i32
    return %c0_i32, %c0_i32_0 : i32, i32
  }
  func.func @transform_7(%arg0: i32) -> (i32, i32) {
    %c0_i32 = arith.constant 0 : i32
    %c0_i32_0 = arith.constant 0 : i32
    %c0_i32_1 = arith.constant 0 : i32
    return %c0_i32, %c0_i32_0 : i32, i32
  }
  func.func @transform_8(%arg0: i32) -> (i32, i32) {
    %c0_i32 = arith.constant 0 : i32
    %c0_i32_0 = arith.constant 0 : i32
    %c0_i32_1 = arith.constant 0 : i32
    return %c0_i32, %c0_i32_0 : i32, i32
  }
  func.func @transform_9(%arg0: i32) -> (i32, i32) {
    %c0_i32 = arith.constant 0 : i32
    %c0_i32_0 = arith.constant 0 : i32
    %c0_i32_1 = arith.constant 0 : i32
    return %c0_i32, %c0_i32_0 : i32, i32
  }
  func.func @transform_10(%arg0: i32) -> (i32, i32) {
    %c0_i32 = arith.constant 0 : i32
    %c0_i32_0 = arith.constant 0 : i32
    %c0_i32_1 = arith.constant 0 : i32
    return %c0_i32, %c0_i32_0 : i32, i32
  }
  func.func @transform_11(%arg0: i32) -> (i32, i32) {
    %c0_i32 = arith.constant 0 : i32
    %c0_i32_0 = arith.constant 0 : i32
    %c0_i32_1 = arith.constant 0 : i32
    return %c0_i32, %c0_i32_0 : i32, i32
  }
  func.func @transform_12(%arg0: i32) -> (i32, i32) {
    %c0_i32 = arith.constant 0 : i32
    %c0_i32_0 = arith.constant 0 : i32
    return %arg0, %c0_i32 : i32, i32
  }
}

</mosaic_0001>

<bundles_post_ra>
// kernel: imagine_forward.5
= control target key start
LH: loop header
LB: loop body
LE: loop exit
PB: predicated region body
PF: predicated region fallthrough
CT: control target
= control target key end

     0   :  { %s939_s15 = smov 0   ;;  %s941_s16 = smov 0   ;;  %s1080_s0 = inlined_call_operand.vmem [shape: f32[32,32], index: 0, kind: input, shape index: {}]   ;;  %s1081_s1 = inlined_call_operand.vmem [shape: bf16[2,32,96], index: 1, kind: input, shape index: {}]   ;;  %s1082_s2 = inlined_call_operand.vmem [shape: bf16[32,96], index: 2, kind: input, shape index: {}]   ;;  %s1083_s3 = inlined_call_operand.vmem [shape: f32[1,96], index: 3, kind: input, shape index: {}]   ;;  %s1084_s4 = inlined_call_operand.vmem [shape: f32[2,32,32], index: 4, kind: output, shape index: {}]  }
   0x1   :  { %s943_s17 = smov 0   ;;  %s945_s18 = smov 0  }
   0x2   :  { %s947_s19 = smov 0  }
   0x3 LB: > { %s26_s20 = sadd.s32 1, %s903_s18  ;;  %s730_s21 = sadd.s32 4294967295, %s907_s19   ;;  %s907_s19 = sphi %s947_s19, %s14_s19   ;;  %s903_s18 = sphi %s945_s18, %s1089_s18   ;;  %s899_s17 = sphi %s943_s17, %s1088_s17   ;;  %s895_s16 = sphi %s941_s16, %s1087_s16   ;;  %s891_s15 = sphi %s939_s15, %s1086_s15  }
   0x4   : > { %p28_p0 = scmp.ge.s32.totalorder %s26_s20, 2  ;;  %p68_p1 = scmp.ne.s32.totalorder %s895_s16, %s891_s15 }
   0x5   : > { %p69_p2 = scmp.eq.s32.totalorder %s907_s19, 0  ;;  %p142_p4 = scmp.eq.s32.totalorder %s730_s21, 1 }
   0x6   : > { %s1091_s20 = smov (%p28_p0, %s26_s20), 0  ;;  %s61_s23 = sadd.s32 1, %s895_s16 }
   0x7   : > { %p70_p3 = por %p69_p2, %p68_p1  ;;  %s57_s22 = ssub.s32 %s903_s18, %s1091_s20 }
   0x8   : > { %p59_p5 = scmp.eq.s32.totalorder %s57_s22, 0  ;;  %p974_p6 = por %p142_p4, %p68_p1 }
   0x9   : > { %p733_p7 = scmp.ge.s32.totalorder %s907_s19, 2 }
   0xa   : > { %s979_s25 = scalar_select %p59_p5, %s895_s16, %s61_s23  }
   0xb   : > { %170 = sbr.rel (%p733_p7) target bundleno = 21 (0x15), region = 24 }
  0x10   : > { %182 = sbr.rel (!%p70_p3) target bundleno = 21 (0x15), region = 32  ;;  %s184_s26 = sand.u32 (%p70_p3), 1, %s895_s16  }
  0x11   : > { %s763_s27 = sshll.u32 (%p70_p3), %s903_s18, 3  ;;  %s734_s28 = sshll.u32 (%p70_p3), %s184_s26, 4 }
  0x12   : > { %s192_s5 = scalar_lea.vmem (%p70_p3), %s1081_s1, %s763_s27  ;;  %s186_s6 = scalar_lea.vmem (%p70_p3), [#allocation3], %s734_s28 }
  0x13   : > { %v209_v0 = vld [vmem:[%s192_s5] sm:$0xff] (%p70_p3)   ;;  %v213_v1 = vld [vmem:[%s192_s5 + $0x10] sm:$0xff] (%p70_p3)  }
  0x14   : > { %210 = vst [vmem:[%s186_s6] sm:$0xff] (%p70_p3), %v209_v0   ;;  %214 = vst [vmem:[%s186_s6 + $0x8] sm:$0xff] (%p70_p3), %v213_v1  }
  0x15 PF: > { %p737_p8 = scmp.ge.s32.totalorder %s907_s19, 1  ;;  %p247_p9 = scmp.lt.s32.totalorder %s907_s19, 3 }
  0x17   : > { %p248_p10 = pnand %p737_p8, %p247_p9 }
  0x18   : > { %s740_s11 = sshll.u32 (!%p248_p10), %s899_s17, 1  ;;  %s911_s26 = smov (!%p248_p10), 64  }
  0x19   : > { %251 = sbr.rel (%p248_p10) target bundleno = 1421 (0x58d), region = 73  ;;  %p284_p11 = scmp.lt.s32.totalorder (!%p248_p10), %s740_s11, 3 }
  0x1a   : > { %s254_s27 = sand.u32 (!%p248_p10), 1, %s891_s15   ;;  %s912_s30 = smov (!%p248_p10), 96  }
  0x1b   : > { %s1019_s28 = sshll.u32 (!%p248_p10), %s254_s27, 4  ;;  %s913_s9 = smov (!%p248_p10), 32  }
  0x1c   : > { %s256_s29 = scalar_lea.vmem (!%p248_p10), [#allocation3], %s1019_s28  ;;  %s739_s10 = sshll.u32 (!%p248_p10), %s254_s27, 5 }
  0x1e   : > { %v841_v2 = vld [vmem:[%s1082_s2 + $0x8] sm:$0xff]   ;;  %v909_v3 = vmov 0.0   ;;  %v842_v4 = vld [vmem:[%s1082_s2] sm:$0xff]   ;;  %vm910_vm0 = vmmov 0   ;;  %s1093_s11 = smov (!%p284_p11, %s740_s11), 3  ;;  %vm300_vm1 = vcmask 261120  }
  0x1f   : > { %780 = vmatprep.subr.bf16.mxu0 %v909_v3  ;;  %788 = vmatprep.subr.bf16.mxu1 %v909_v3  ;;  %s741_s12 = sshll.u32 %s1093_s11, 3  ;;  %v1010_v10 = vld [vmem:[%s1083_s3] ss:$0 sm:$0xff]  ;;  %v843_v39 = vld [vmem:[%s1082_s2 + $0x8] sm:$0xff]   ;;  %s282_s11 = scalar_lea.vmem [#allocation4], %s739_s10 }
  0x20   : > { %781 = vmatpush3.bf16.msra.mxu0 %v841_v2  ;;  %784 = vmatprep.mubr.msk.bf16.mxu0 %vm910_vm0, %v909_v3  ;;  %s287_s21 = scalar_lea.vmem %s1080_s0, %s741_s12  ;;  %v766_v17 = vld [vmem:[%s256_s29] sm:$0xff]   ;;  %v773_v62 = vld [vmem:[%s256_s29 + $0x8] sm:$0xff]   ;;  %s764_s15 = sshll.u32 (%p974_p6), %s899_s17, 4 }
  0x21   : > { %782 = vmatprep.subr.bf16.mxu0 %v909_v3  ;;  %792 = vmatprep.mubr.msk.bf16.mxu1 %vm910_vm0, %v909_v3  ;;  %v298_v5 = vld [vmem:[%s287_s21] sm:$0xff]  ;;  %v299_v6 = vld [vmem:[%s287_s21 + $0x8] sm:$0xff]  ;;  %v767_v18 = vunpack.c.l.bf16 %v766_v17  ;;  %v768_v20 = vunpack.c.h.bf16 %v766_v17  ;;  %v771_v63 = vunpack.c.l.bf16 %v773_v62  ;;  %v772_v1 = vunpack.c.h.bf16 %v773_v62  ;;  %s601_s14 = scalar_lea.vmem (%p974_p6), %s1084_s4, %s764_s15 }
  0x22   : > { %301 = vst.msk [vmem:[#allocation2] sm:$0xff] %vm300_vm1, %v298_v5  ;;  %302 = vst.msk [vmem:[#allocation2 + $0x8] sm:$0xff] %vm300_vm1, %v299_v6  ;;  %789 = vmatpush3.bf16.msra.mxu1 %v843_v39  ;;  %v844_v41 = vld [vmem:[%s1082_s2] sm:$0xff]  }
  0x23   : > { %790 = vmatprep.subr.bf16.mxu1 %v909_v3 }
  0x24   : > { %783 = vmatpush3.bf16.msra.mxu0 %v842_v4 }
  0x26   : > { %791 = vmatpush3.bf16.msra.mxu1 %v844_v41 }
  0x29   : > { %v303_v7 = vld [vmem:[#allocation2] sm:$0xff]  ;;  %v304_v8 = vld [vmem:[#allocation2 + $0x8] sm:$0xff] }
  0x2a   : > { %v305_v9 = vpack.c.bf16 %v304_v8, %v303_v7 }
  0x2c   : > { %785 = vmatmul.mubr.msk.bf16.vlgmr.msra.gmra.mxu0 %vm300_vm1, %v305_v9 }
  0xec   : > { %v367_v11 = vpop.f32.mrf.mxu0 }
  0xed   : > { %v368_v12 = vadd.f32 %v1010_v10, %v367_v11 }
  0xee   : > { %v786_v13 = vpop.f32.mrf.mxu0 }
  0xef   : > { %394 = vrot.lane.b32.xlu0 %v368_v12, %s911_s26  ;;  %v378_v19 = vadd.f32 %v767_v18, %v368_v12 }
  0xf0   : > { %v370_v14 = vpop.f32.mrf.mxu0 }
  0xf1   : > { %v371_v15 = vadd.f32 %v1010_v10, %v370_v14  ;;  %v746_v21 = vmul.f32 -1.442695, %v378_v19 }
  0xf2   : > { %v787_v16 = vpop.f32.mrf.mxu0 }
  0xf3   : > { %396 = vrot.lane.b32.xlu0 %v371_v15, %s911_s26  ;;  %v379_v22 = vadd.f32 %v768_v20, %v371_v15  ;;  %845 = vpow2.f32 %v746_v21 }
  0xf5   : > { %v747_v23 = vmul.f32 -1.442695, %v379_v22 }
  0xf7   : > { %847 = vpow2.f32 %v747_v23 }
 0x100   : > { %v846_v24 = vpop.eup %845 }
 0x101   : > { %v386_v25 = vadd.f32 1.0, %v846_v24 }
 0x103   : > { %849 = vrcp.f32 %v386_v25 }
 0x104   : > { %v848_v26 = vpop.eup %847 }
 0x105   : > { %v387_v27 = vadd.f32 1.0, %v848_v26 }
 0x107   : > { %851 = vrcp.f32 %v387_v27 }
 0x110   : > { %v850_v28 = vpop.eup %849 }
 0x111   : > { %v414_v45 = vsub.f32 1.0, %v850_v28 }
 0x114   : > { %v852_v31 = vpop.eup %851 }
 0x115   : > { %v415_v47 = vsub.f32 1.0, %v852_v31 }
 0x161   : > { %v395_v29 = vpop.permute.xlu0 %394 }
 0x162   : > { %v400_v30 = vmul.f32 %v850_v28, %v395_v29 }
 0x164   : > { %404 = vrot.lane.b32.xlu1 %v400_v30, %s911_s26 }
 0x165   : > { %v397_v32 = vpop.permute.xlu0 %396 }
 0x166   : > { %v401_v33 = vmul.f32 %v852_v31, %v397_v32 }
 0x168   : > { %406 = vrot.lane.b32.xlu1 %v401_v33, %s911_s26 }
 0x1d6   : > { %v405_v34 = vpop.permute.xlu1 %404 }
 0x1d7   : > { %v410_v35 = vadd.f32 %v767_v18, %v405_v34 }
 0x1d9   : > { %853 = vtanh.f32 %v410_v35 }
 0x1da   : > { %v407_v36 = vpop.permute.xlu1 %406 }
 0x1db   : > { %v411_v37 = vadd.f32 %v768_v20, %v407_v36 }
 0x1dd   : > { %855 = vtanh.f32 %v411_v37 }
 0x1e6   : > { %v854_v38 = vpop.eup %853 }
 0x1e7   : > { %418 = vrot.lane.b32.xlu0 %v854_v38, %s912_s30 }
 0x1ea   : > { %v856_v40 = vpop.eup %855 }
 0x1eb   : > { %428 = vrot.lane.b32.xlu0 %v303_v7, %s913_s9  ;;  %420 = vrot.lane.b32.xlu1 %v856_v40, %s912_s30 }
 0x1ef   : > { %430 = vrot.lane.b32.xlu1 %v304_v8, %s913_s9 }
 0x259   : > { %v419_v42 = vpop.permute.xlu0 %418 }
 0x25a   : > { %v424_v49 = vmul.f32 %v419_v42, %v414_v45 }
 0x25d   : > { %v429_v43 = vpop.permute.xlu0 %428  ;;  %v421_v44 = vpop.permute.xlu1 %420 }
 0x25e   : > { %v434_v46 = vmul.f32 %v850_v28, %v429_v43  ;;  %v425_v50 = vmul.f32 %v421_v44, %v415_v47 }
 0x260   : > { %v436_v52 = vadd.f32 %v434_v46, %v424_v49 }
 0x261   : > { %v431_v48 = vpop.permute.xlu1 %430 }
 0x262   : > { %v435_v51 = vmul.f32 %v852_v31, %v431_v48 }
 0x264   : > { %v437_v53 = vadd.f32 %v435_v51, %v425_v50 }
 0x266   : > { %v448_v54 = vpack.c.bf16 %v437_v53, %v436_v52 }
 0x268   : > { %461 = vrot.lane.b32.xlu0 %v448_v54, %s912_s30 }
 0x2da   : > { %v462_v55 = vpop.permute.xlu0 %461 }
 0x2db   : > { %793 = vmatmul.mubr.msk.bf16.vlgmr.msra.gmra.mxu1 %vm300_vm1, %v462_v55 }
 0x39b   : > { %v512_v56 = vpop.f32.mrf.mxu1 }
 0x39c   : > { %v513_v57 = vadd.f32 %v1010_v10, %v512_v56 }
 0x39d   : > { %v794_v58 = vpop.f32.mrf.mxu1 }
 0x39e   : > { %540 = vrot.lane.b32.xlu1 %v513_v57, %s911_s26  ;;  %v524_v0 = vadd.f32 %v771_v63, %v513_v57 }
 0x39f   : > { %v515_v59 = vpop.f32.mrf.mxu1 }
 0x3a0   : > { %v516_v60 = vadd.f32 %v1010_v10, %v515_v59  ;;  %v754_v2 = vmul.f32 -1.442695, %v524_v0 }
 0x3a1   : > { %v795_v61 = vpop.f32.mrf.mxu1 }
 0x3a2   : > { %542 = vrot.lane.b32.xlu0 %v516_v60, %s911_s26  ;;  %v525_v3 = vadd.f32 %v772_v1, %v516_v60  ;;  %857 = vpow2.f32 %v754_v2 }
 0x3a4   : > { %v755_v4 = vmul.f32 -1.442695, %v525_v3 }
 0x3a6   : > { %859 = vpow2.f32 %v755_v4 }
 0x3af   : > { %v858_v5 = vpop.eup %857 }
 0x3b0   : > { %v532_v6 = vadd.f32 1.0, %v858_v5 }
 0x3b2   : > { %861 = vrcp.f32 %v532_v6 }
 0x3b3   : > { %v860_v7 = vpop.eup %859 }
 0x3b4   : > { %v533_v8 = vadd.f32 1.0, %v860_v7 }
 0x3b6   : > { %863 = vrcp.f32 %v533_v8 }
 0x3bf   : > { %v862_v9 = vpop.eup %861 }
 0x3c0   : > { %v560_v21 = vsub.f32 1.0, %v862_v9  ;;  %v572_v23 = vmul.f32 %v862_v9, %v436_v52 }
 0x3c3   : > { %v864_v12 = vpop.eup %863 }
 0x3c4   : > { %v561_v26 = vsub.f32 1.0, %v864_v12  ;;  %v573_v29 = vmul.f32 %v864_v12, %v437_v53 }
 0x410   : > { %v541_v10 = vpop.permute.xlu1 %540 }
 0x411   : > { %v546_v11 = vmul.f32 %v862_v9, %v541_v10 }
 0x413   : > { %550 = vrot.lane.b32.xlu1 %v546_v11, %s911_s26 }
 0x414   : > { %v543_v13 = vpop.permute.xlu0 %542 }
 0x415   : > { %v547_v14 = vmul.f32 %v864_v12, %v543_v13 }
 0x417   : > { %552 = vrot.lane.b32.xlu0 %v547_v14, %s911_s26 }
 0x485   : > { %v551_v15 = vpop.permute.xlu1 %550 }
 0x486   : > { %v556_v16 = vadd.f32 %v771_v63, %v551_v15 }
 0x488   : > { %865 = vtanh.f32 %v556_v16 }
 0x489   : > { %v553_v17 = vpop.permute.xlu0 %552 }
 0x48a   : > { %v557_v18 = vadd.f32 %v772_v1, %v553_v17 }
 0x48c   : > { %867 = vtanh.f32 %v557_v18 }
 0x495   : > { %v866_v19 = vpop.eup %865 }
 0x496   : > { %564 = vrot.lane.b32.xlu1 %v866_v19, %s912_s30 }
 0x499   : > { %v868_v20 = vpop.eup %867 }
 0x49a   : > { %440 = vrot.lane.b32.xlu1 %v436_v52, %s912_s30  ;;  %566 = vrot.lane.b32.xlu0 %v868_v20, %s912_s30 }
 0x49e   : > { %442 = vrot.lane.b32.xlu0 %v437_v53, %s912_s30 }
 0x508   : > { %v565_v22 = vpop.permute.xlu1 %564 }
 0x509   : > { %v570_v24 = vmul.f32 %v565_v22, %v560_v21 }
 0x50b   : > { %v574_v25 = vadd.f32 %v572_v23, %v570_v24 }
 0x50c   : > { %v441_v27 = vpop.permute.xlu1 %440  ;;  %v567_v28 = vpop.permute.xlu0 %566 }
 0x50d   : > { %446 = vst.msk [vmem:[%s282_s11] sm:$0xff] %vm300_vm1, %v441_v27  ;;  %v571_v30 = vmul.f32 %v567_v28, %v561_v26  ;;  %578 = vrot.lane.b32.xlu1 %v574_v25, %s912_s30 }
 0x50f   : > { %v575_v31 = vadd.f32 %v573_v29, %v571_v30 }
 0x510   : > { %v443_v32 = vpop.permute.xlu0 %442 }
 0x511   : > { %447 = vst.msk [vmem:[%s282_s11 + $0x8] sm:$0xff] %vm300_vm1, %v443_v32  ;;  %580 = vrot.lane.b32.xlu0 %v575_v31, %s912_s30 }
 0x514   : > { %v636_v35 = vld [vmem:[%s282_s11] sm:$0xff] (%p974_p6) }
 0x515   : > { %637 = vst [vmem:[%s601_s14] sm:$0xff] (%p974_p6), %v636_v35 }
 0x518   : > { %v638_v36 = vld [vmem:[%s282_s11 + $0x8] sm:$0xff] (%p974_p6) }
 0x519   : > { %639 = vst [vmem:[%s601_s14 + $0x8] sm:$0xff] (%p974_p6), %v638_v36 }
 0x57f   : > { %v579_v33 = vpop.permute.xlu1 %578 }
 0x580   : > { %756 = vst.msk [vmem:[%s282_s11 + $0x10] sm:$0xff] %vm300_vm1, %v579_v33  ;;  %587 = vst.msk [vmem:[#allocation2] sm:$0xff] %vm300_vm1, %v579_v33  ;;  %595 = sbr.rel (!%p974_p6) target bundleno = 1421 (0x58d), region = 85 }
 0x583   : > { %v581_v34 = vpop.permute.xlu0 %580 }
 0x584   : > { %757 = vst.msk [vmem:[%s282_s11 + $0x18] sm:$0xff] %vm300_vm1, %v581_v34  ;;  %588 = vst.msk [vmem:[#allocation2 + $0x8] sm:$0xff] %vm300_vm1, %v581_v34 }
 0x587   : > { %v640_v37 = vld [vmem:[%s282_s11 + $0x10] sm:$0xff] }
 0x588   : > { %641 = vst [vmem:[%s601_s14 + $0x20] sm:$0xff] %v640_v37 }
 0x58b   : > { %v642_v38 = vld [vmem:[%s282_s11 + $0x18] sm:$0xff] }
 0x58c   : > { %643 = vst [vmem:[%s601_s14 + $0x28] sm:$0xff] %v642_v38 }
 0x58d PF: > { %s14_s19 = sadd.s32 1, %s907_s19   ;;  %s1086_s15 = smov %s895_s16 }
 0x58e   : > { %p11_p12 = scmp.ge.s32.totalorder %s14_s19, 4   ;;  %s1087_s16 = smov %s979_s25 }
 0x58f   : > { %s1088_s17 = smov %s903_s18  ;;  %s1089_s18 = smov %s1091_s20 }
 0x590   :  { %13 = sbr.rel (!%p11_p12) target bundleno = 3 (0x3), region = 159 }

// kernel: imagine_forward.4
= control target key start
LH: loop header
LB: loop body
LE: loop exit
PB: predicated region body
PF: predicated region fallthrough
CT: control target
= control target key end

     0   :  { %s3785_s21 = smov 0   ;;  %s4472_s0 = inlined_call_operand.vmem [shape: bf16[128,16], index: 0, kind: input, shape index: {}]   ;;  %s4473_s1 = inlined_call_operand.vmem [shape: bf16[16,8,8], index: 1, kind: input, shape index: {}]   ;;  %s4474_s2 = inlined_call_operand.vmem [shape: f32[16,8], index: 2, kind: input, shape index: {}]   ;;  %s4475_s3 = inlined_call_operand.vmem [shape: bf16[16,32], index: 3, kind: input, shape index: {}]   ;;  %s4476_s4 = inlined_call_operand.vmem [shape: f32[1,32], index: 4, kind: input, shape index: {}]   ;;  %s4477_s5 = inlined_call_operand.vmem [shape: bf16[32,96], index: 5, kind: input, shape index: {}]   ;;  %s4478_s6 = inlined_call_operand.vmem [shape: bf16[32,32], index: 6, kind: input, shape index: {}]   ;;  %s4479_s7 = inlined_call_operand.vmem [shape: f32[1,32], index: 7, kind: input, shape index: {}]   ;;  %s4480_s8 = inlined_call_operand.vmem [shape: bf16[32,32], index: 8, kind: input, shape index: {}]   ;;  %s4481_s9 = inlined_call_operand.vmem [shape: f32[1,32], index: 9, kind: input, shape index: {}]   ;;  %s4482_s10 = inlined_call_operand.vmem [shape: bf16[32,96], index: 10, kind: input, shape index: {}]   ;;  %s4483_s11 = inlined_call_operand.vmem [shape: f32[1,96], index: 11, kind: input, shape index: {}]   ;;  %s4484_s12 = inlined_call_operand.vmem [shape: bf16[128,96], index: 12, kind: output, shape index: {}]  }
   0x1 LB: > { %s3791_s22 = sadd.s32 4294967295, %s3710_s21   ;;  %p3132_p0 = scmp.ge.s32.totalorder %s3710_s21, 1  ;;  %s3710_s21 = sphi %s3785_s21, %s22_s21  }
   0x2   : > { %p383_p1 = scmp.lt.s32.totalorder %s3710_s21, 3 }
   0x4   : > { %p384_p2 = pnand %p3132_p0, %p383_p1 }
   0x5   : > { %s3133_s25 = sshll.u32 (!%p384_p2), %s3791_s22, 3  ;;  %s3714_s18 = smov (!%p384_p2), 96  }
   0x6   : > { %387 = sbr.rel (%p384_p2) target bundleno = 2649 (0xa59), region = 68  ;;  %p435_p3 = scmp.lt.s32.totalorder (!%p384_p2), %s3133_s25, 15 }
   0x7   : > { %s3715_s24 = smov (!%p384_p2), 64   ;;  %s3717_s27 = smov (!%p384_p2), 112  }
   0x8   : > { %s3718_s28 = smov (!%p384_p2), 48   ;;  %s3719_s15 = smov (!%p384_p2), 16  }
   0x9   : > { %p446_p4 = scmp.lt.s32.totalorder (!%p384_p2), %s3791_s22, 1 }
   0xb   : > { %v3627_v0 = vld [vmem:[%s4475_s3] sm:$0xff]   ;;  %s4522_s25 = smov (!%p435_p3, %s3133_s25), 15  ;;  %vm500_vm0 = vcmask 130048   ;;  %v3632_v5 = vld [vmem:[%s4477_s5 + $0x8] sm:$0xff]   ;;  %vm4485_vm1 = vcmask 261120   ;;  %v3712_v36 = vmov 0.0  }
   0xc   : > { %3339 = vmatprep.subr.bf16.mxu0 %v3627_v0  ;;  %3589 = vmatprep.subr.bf16.mxu1 %v3627_v0  ;;  %s3799_s26 = sshll.u32 %s4522_s25, 2  ;;  %v3633_v6 = vld [vmem:[%s4477_s5] sm:$0xff]   ;;  %vm3713_vm2 = vmmov 0   ;;  %vm716_vm3 = vcmask 64512   ;;  %vm1290_vm4 = vcmask 1043456   ;;  %s3716_s25 = smov 80  }
   0xd   : > { %3340 = vmatpush3.bf16.msra.mxu0 %v3627_v0  ;;  %3590 = vmatpush3.bf16.msra.mxu1 %v3627_v0  ;;  %s438_s29 = scalar_lea.vmem %s4472_s0, %s3799_s26  ;;  %v3140_v10 = vld [vmem:[%s4476_s4] ss:$0 sm:$0xff]  ;;  %s3856_s23 = scalar_lea.vmem %s4473_s1, %s3799_s26 }
   0xe   : > { %v3628_v1 = vld [vmem:[%s438_s29] sm:$0xff]   ;;  %v3629_v2 = vld [vmem:[%s438_s29 + $0x8] sm:$0xff]   ;;  %v3630_v3 = vld [vmem:[%s438_s29 + $0x10] sm:$0xff]   ;;  %3349 = vmatprep.subr.bf16.mxu1 %v3632_v5  ;;  %3361 = vmatprep.subr.bf16.mxu0 %v3712_v36  ;;  %s4524_s22 = smov (!%p446_p4, %s3791_s22), 1 }
   0xf   : > { %3341 = vmatprep.mubr.msk.bf16.mxu0 %vm500_vm0, %v3628_v1  ;;  %v3631_v4 = vld [vmem:[%s438_s29 + $0x18] sm:$0xff]   ;;  %3345 = vmatprep.mubr.msk.bf16.mxu1 %vm500_vm0, %v3630_v3  ;;  %v3859_v53 = vld [vmem:[%s3856_s23] sm:$0xff]   ;;  %v3863_v55 = vld [vmem:[%s3856_s23 + $0x8] sm:$0xff]   ;;  %s3137_s16 = sshll.u32 %s4524_s22, 3  ;;  %s4451_s22 = scalar_lea.vmem %s4484_s12, %s3799_s26 }
  0x10   : > { %3342 = vmatmul.mubr.msk.bf16.vlgmr.msra.gmra.mxu0 %vm500_vm0, %v3629_v2  ;;  %3346 = vmatmul.mubr.msk.bf16.vlgmr.msra.gmra.mxu1 %vm500_vm0, %v3631_v4  ;;  %v3230_v54 = vunpack.c.h.bf16 %v3859_v53  ;;  %v3234_v57 = vunpack.c.h.bf16 %v3863_v55  ;;  %v3229_v60 = vunpack.c.l.bf16 %v3859_v53  ;;  %v3233_v63 = vunpack.c.l.bf16 %v3863_v55  ;;  %v3885_v3 = vld [vmem:[%s3856_s23 + $0x10] sm:$0xff]   ;;  %s449_s19 = scalar_lea.vmem %s4474_s2, %s3137_s16 }
  0x11   : > { %3350 = vmatpush3.bf16.msra.mxu1 %v3632_v5  ;;  %3363 = vmatprep.mubr.msk.bf16.mxu0 %vm3713_vm2, %v3712_v36  ;;  %v3237_v4 = vunpack.c.l.bf16 %v3885_v3 }
  0x12   : > { %3351 = vmatprep.subr.bf16.mxu1 %v3633_v6  ;;  %v709_v56 = vsub.f32 1.0, %v3230_v54  ;;  %v711_v59 = vsub.f32 1.0, %v3234_v57  ;;  %v708_v62 = vsub.f32 1.0, %v3229_v60  ;;  %v710_v1 = vsub.f32 1.0, %v3233_v63 }
  0x13   : > { %v712_v5 = vsub.f32 1.0, %v3237_v4  ;;  %vm3957_vm5 = vcmp.gt.f32.partialorder %v3229_v60, 0.5  ;;  %vm3969_vm6 = vcmp.gt.f32.partialorder %v3230_v54, 0.5  ;;  %vm3981_vm7 = vcmp.gt.f32.partialorder %v3233_v63, 0.5 }
  0x14   : > { %v720_v58 = vsel %vm716_vm3, %v709_v56, 0.0  ;;  %v726_v61 = vsel %vm716_vm3, %v711_v59, 0.0  ;;  %v717_v0 = vsel %vm716_vm3, %v708_v62, 0.0  ;;  %v723_v2 = vsel %vm716_vm3, %v710_v1, 0.0 }
  0x15   : > { %3352 = vmatpush3.bf16.msra.mxu1 %v3633_v6  ;;  %v729_v6 = vsel %vm716_vm3, %v712_v5, 0.0  ;;  %vm3993_vm8 = vcmp.gt.f32.partialorder %v3234_v57, 0.5  ;;  %vm4005_vm9 = vcmp.gt.f32.partialorder %v3237_v4, 0.5 }
  0x16   : > { %3367 = vmatprep.subr.bf16.mxu1 %v3712_v36 }
  0xd0   : > { %v3343_v7 = vpop.f32.mrf.mxu0  ;;  %v3347_v9 = vpop.f32.mrf.mxu1 }
  0xd1   : > { %v556_v16 = vadd.f32 %v3343_v7, %v3140_v10  ;;  %v572_v27 = vadd.f32 %v3347_v9, %v3140_v10 }
  0xd2   : > { %v547_v8 = vpop.f32.mrf.mxu0  ;;  %v563_v12 = vpop.f32.mrf.mxu1 }
  0xd3   : > { %v548_v13 = vadd.f32 %v3140_v10, %v547_v8  ;;  %v564_v15 = vadd.f32 %v3140_v10, %v563_v12  ;;  %v580_v26 = vmax.f32 %v556_v16, 0.0  ;;  %v584_v33 = vmax.f32 %v572_v27, 0.0 }
  0xd4   : > { %v3344_v11 = vpop.f32.mrf.mxu0  ;;  %v3348_v18 = vpop.f32.mrf.mxu1 }
  0xd5   : > { %v559_v14 = vadd.f32 %v3344_v11, %v3140_v10  ;;  %v578_v22 = vmax.f32 %v548_v13, 0.0  ;;  %v582_v24 = vmax.f32 %v564_v15, 0.0  ;;  %v575_v28 = vadd.f32 %v3348_v18, %v3140_v10 }
  0xd6   : > { %v550_v17 = vpop.f32.mrf.mxu0  ;;  %v566_v21 = vpop.f32.mrf.mxu1 }
  0xd7   : > { %v551_v19 = vadd.f32 %v3140_v10, %v550_v17  ;;  %v581_v20 = vmax.f32 %v559_v14, 0.0  ;;  %v567_v25 = vadd.f32 %v3140_v10, %v566_v21  ;;  %v585_v34 = vmax.f32 %v575_v28, 0.0 }
  0xd9   : > { %v579_v23 = vmax.f32 %v551_v19, 0.0  ;;  %v583_v30 = vmax.f32 %v567_v25, 0.0  ;;  %v587_v31 = vpack.c.bf16 %v581_v20, %v580_v26  ;;  %v589_v35 = vpack.c.bf16 %v585_v34, %v584_v33 }
  0xdb   : > { %v586_v29 = vpack.c.bf16 %v579_v23, %v578_v22  ;;  %v588_v32 = vpack.c.bf16 %v583_v30, %v582_v24  ;;  %v3238_v24 = vunpack.c.h.bf16 %v3885_v3 }
  0xdd   : > { %3353 = vmatprep.mubr.msk.bf16.mxu1 %vm4485_vm1, %v586_v29  ;;  %v713_v26 = vsub.f32 1.0, %v3238_v24  ;;  %vm4016_vm10 = vcmp.gt.f32.partialorder %v3238_v24, 0.5 }
  0xde   : > { %3354 = vmatmul.mubr.msk.bf16.vlgmr.msra.gmra.mxu1 %vm4485_vm1, %v587_v31 }
  0xdf   : > { %3357 = vmatprep.mubr.msk.bf16.mxu1 %vm4485_vm1, %v588_v32  ;;  %v732_v27 = vsel %vm716_vm3, %v713_v26, 0.0 }
  0xe6   : > { %3358 = vmatmul.mubr.msk.bf16.gmra.mxu1 %vm4485_vm1, %v589_v35 }
  0xe7   : > { %3369 = vmatprep.mubr.msk.bf16.mxu1 %vm3713_vm2, %v3712_v36 }
 0x19e   : > { %v3355_v37 = vpop.f32.mrf.mxu1 }
 0x19f   : > { %v3828_v38 = vpack.c.bf16 %v3355_v37, %v3355_v37 }
 0x1a0   : > { %v653_v39 = vpop.f32.mrf.mxu1 }
 0x1a1   : > { %v3830_v40 = vpack.c.bf16 %v653_v39, %v653_v39  ;;  %840 = vrot.lane.b32.xlu1 %v3828_v38, %s3714_s18 }
 0x1a2   : > { %v3356_v41 = vpop.f32.mrf.mxu1 }
 0x1a3   : > { %v3833_v42 = vpack.c.bf16 %v3356_v41, %v3356_v41  ;;  %742 = vrot.lane.b32.xlu0 %v3830_v40, %s3714_s18 }
 0x1a4   : > { %v656_v43 = vpop.f32.mrf.mxu1 }
 0x1a5   : > { %v3836_v44 = vpack.c.bf16 %v656_v43, %v656_v43  ;;  %889 = vrot.lane.b32.xlu1 %v3833_v42, %s3714_s18 }
 0x1a6   : > { %v3359_v45 = vpop.f32.mrf.mxu1 }
 0x1a7   : > { %791 = vrot.lane.b32.xlu0 %v3836_v44, %s3714_s18  ;;  %v3843_v50 = vpack.c.bf16 %v3359_v45, %v3359_v45 }
 0x1a8   : > { %v669_v46 = vpop.f32.mrf.mxu1 }
 0x1a9   : > { %v3840_v47 = vpack.c.bf16 %v669_v46, %v669_v46 }
 0x1aa   : > { %v3360_v48 = vpop.f32.mrf.mxu1 }
 0x1ab   : > { %938 = vrot.lane.b32.xlu0 %v3840_v47, %s3714_s18  ;;  %v3849_v52 = vpack.c.bf16 %v3360_v48, %v3360_v48 }
 0x1ac   : > { %v672_v49 = vpop.f32.mrf.mxu1 }
 0x1ad   : > { %v3845_v51 = vpack.c.bf16 %v672_v49, %v672_v49 }
 0x1af   : > { %1036 = vrot.lane.b32.xlu0 %v3843_v50, %s3714_s18  ;;  %987 = vrot.lane.b32.xlu1 %v3845_v51, %s3714_s18 }
 0x1b3   : > { %1085 = vrot.lane.b32.xlu1 %v3849_v52, %s3714_s18 }
 0x1ce   : > { %721 = vadd.xlane.f32.xlu0 %v720_v58 }
 0x1d2   : > { %727 = vadd.xlane.f32.xlu0 %v726_v61 }
 0x1d7   : > { %718 = vadd.xlane.f32.xlu1 %v717_v0 }
 0x1db   : > { %724 = vadd.xlane.f32.xlu1 %v723_v2 }
 0x1e8   : > { %1334 = vrot.lane.b32.xlu0 %v3836_v44, %s3715_s24 }
 0x1ec   : > { %1285 = vrot.lane.b32.xlu1 %v3830_v40, %s3715_s24 }
 0x207   : > { %733 = vadd.xlane.f32.xlu0 %v732_v27 }
 0x210   : > { %730 = vadd.xlane.f32.xlu1 %v729_v6 }
 0x213   : > { %v841_v9 = vpop.permute.xlu1 %840 }
 0x214   : > { %v846_v12 = vsel %vm500_vm0, %v841_v9, 0 }
 0x215   : > { %v743_v7 = vpop.permute.xlu0 %742 }
 0x216   : > { %v748_v8 = vsel %vm500_vm0, %v743_v7, 0 }
 0x217   : > { %3362 = vmatpush3.bf16.xpose.msra.mxu0 %v748_v8  ;;  %v890_v13 = vpop.permute.xlu1 %889 }
 0x218   : > { %3373 = vmatprep.subr.bf16.mxu0 %v3712_v36  ;;  %v895_v14 = vsel %vm500_vm0, %v890_v13, 0 }
 0x219   : > { %v792_v10 = vpop.permute.xlu0 %791 }
 0x21a   : > { %v797_v11 = vsel %vm500_vm0, %v792_v10, 0 }
 0x21b   : > { %3368 = vmatpush3.bf16.xpose.msra.mxu1 %v797_v11 }
 0x21c   : > { %3379 = vmatprep.subr.bf16.mxu1 %v3712_v36 }
 0x21d   : > { %v939_v15 = vpop.permute.xlu0 %938 }
 0x21e   : > { %3364 = vmatmul.mubr.msk.bf16.vlgmr.msra.gmra.mxu0 %vm500_vm0, %v3830_v40  ;;  %v944_v16 = vsel %vm500_vm0, %v939_v15, 0  ;;  %v3245_v15 = vld [vmem:[%s3856_s23 + $0x18] sm:$0xff]  }
 0x21f   : > { %3374 = vmatpush3.bf16.xpose.msra.mxu0 %v846_v12  ;;  %3375 = vmatprep.mubr.msk.bf16.mxu0 %vm3713_vm2, %v3712_v36  ;;  %v3241_v4 = vunpack.c.l.bf16 %v3245_v15  ;;  %v3242_v24 = vunpack.c.h.bf16 %v3245_v15 }
 0x220   : > { %3385 = vmatprep.subr.bf16.mxu0 %v3712_v36 }
 0x221   : > { %1382 = vrot.lane.b32.xlu1 %v3828_v38, %s3715_s24  ;;  %v988_v17 = vpop.permute.xlu1 %987  ;;  %v1037_v19 = vpop.permute.xlu0 %1036  ;;  %vm4023_vm11 = vcmp.gt.f32.partialorder %v3241_v4, 0.5  ;;  %vm4033_vm12 = vcmp.gt.f32.partialorder %v3242_v24, 0.5 }
 0x222   : > { %3370 = vmatmul.mubr.msk.bf16.vlgmr.msra.gmra.mxu1 %vm500_vm0, %v3836_v44  ;;  %v993_v18 = vsel %vm500_vm0, %v988_v17, 0  ;;  %v1042_v20 = vsel %vm500_vm0, %v1037_v19, 0 }
 0x223   : > { %3380 = vmatpush3.bf16.xpose.msra.mxu1 %v895_v14  ;;  %3381 = vmatprep.mubr.msk.bf16.mxu1 %vm3713_vm2, %v3712_v36 }
 0x224   : > { %3391 = vmatprep.subr.bf16.mxu1 %v3712_v36 }
 0x225   : > { %v1086_v21 = vpop.permute.xlu1 %1085 }
 0x226   : > { %3376 = vmatmul.mubr.msk.bf16.vlgmr.msra.gmra.mxu0 %vm500_vm0, %v3828_v38  ;;  %v1091_v22 = vsel %vm500_vm0, %v1086_v21, 0 }
 0x227   : > { %3386 = vmatpush3.bf16.xpose.msra.mxu0 %v944_v16  ;;  %3387 = vmatprep.mubr.msk.bf16.mxu0 %vm3713_vm2, %v3712_v36 }
 0x228   : > { %3397 = vmatprep.subr.bf16.mxu0 %v3712_v36 }
 0x22a   : > { %3382 = vmatmul.mubr.msk.bf16.vlgmr.msra.gmra.mxu1 %vm500_vm0, %v3833_v42 }
 0x22b   : > { %3392 = vmatpush3.bf16.xpose.msra.mxu1 %v993_v18  ;;  %3393 = vmatprep.mubr.msk.bf16.mxu1 %vm3713_vm2, %v3712_v36 }
 0x22c   : > { %3403 = vmatprep.subr.bf16.mxu1 %v3712_v36 }
 0x22e   : > { %3388 = vmatmul.mubr.msk.bf16.vlgmr.msra.gmra.mxu0 %vm500_vm0, %v3840_v47 }
 0x22f   : > { %3398 = vmatpush3.bf16.xpose.msra.mxu0 %v1042_v20  ;;  %3399 = vmatprep.mubr.msk.bf16.mxu0 %vm3713_vm2, %v3712_v36 }
 0x230   : > { %3409 = vmatprep.subr.bf16.mxu0 %v3712_v36 }
 0x232   : > { %3394 = vmatmul.mubr.msk.bf16.vlgmr.msra.gmra.mxu1 %vm500_vm0, %v3845_v51 }
 0x233   : > { %3404 = vmatpush3.bf16.xpose.msra.mxu1 %v1091_v22  ;;  %3405 = vmatprep.mubr.msk.bf16.mxu1 %vm3713_vm2, %v3712_v36 }
 0x234   : > { %3415 = vmatprep.subr.bf16.mxu1 %v3712_v36 }
 0x236   : > { %3400 = vmatmul.mubr.msk.bf16.vlgmr.msra.gmra.mxu0 %vm500_vm0, %v3843_v50 }
 0x237   : > { %3411 = vmatprep.mubr.msk.bf16.mxu0 %vm3713_vm2, %v3712_v36 }
 0x23a   : > { %3406 = vmatmul.mubr.msk.bf16.vlgmr.msra.gmra.mxu1 %vm500_vm0, %v3849_v52 }
 0x23b   : > { %3417 = vmatprep.mubr.msk.bf16.mxu1 %vm3713_vm2, %v3712_v36 }
 0x257   : > { %v3941_v23 = vpop.xlane.xlu0 %721 }
 0x258   : > { %vm1246_vm14 = vcmp.lt.f32.partialorder %v3941_v23, 0.5 }
 0x25b   : > { %v3944_v25 = vpop.xlane.xlu0 %727 }
 0x25c   : > { %vm4487_vm1 = vcmp.lt.f32.partialorder %v3944_v25, 0.5 }
 0x25f   : > { %v1335_v28 = vpop.permute.xlu0 %1334 }
 0x260   : > { %v1340_v29 = vsel %vm1290_vm4, %v1335_v28, 0  ;;  %v3948_v30 = vpop.xlane.xlu1 %718 }
 0x261   : > { %3416 = vmatpush3.bf16.msra.mxu1 %v1340_v29  ;;  %vm1245_vm13 = vcmp.lt.f32.partialorder %v3948_v30, 0.5 }
 0x262   : > { %3427 = vmatprep.subr.bf16.mxu1 %v3712_v36 }
 0x264   : > { %v3951_v31 = vpop.xlane.xlu1 %724 }
 0x265   : > { %vm4486_vm15 = vcmp.lt.f32.partialorder %v3951_v31, 0.5 }
 0x268   : > { %v1286_v32 = vpop.permute.xlu1 %1285 }
 0x269   : > { %v1292_v33 = vsel %vm1290_vm4, %v1286_v32, 0 }
 0x26a   : > { %3410 = vmatpush3.bf16.msra.mxu0 %v1292_v33 }
 0x26b   : > { %3421 = vmatprep.subr.bf16.mxu0 %v3712_v36 }
 0x2de   : > { %v784_v34 = vpop.f32.mrf.mxu0 }
 0x2df   : > { %v1133_v37 = vmul.f32 0.25, %v784_v34 }
 0x2e0   : > { %v3365_v39 = vpop.f32.mrf.mxu0 }
 0x2e1   : > { %v3963_v41 = vsel %vm3957_vm5, -1e+30, %v1133_v37 }
 0x2e2   : > { %v787_v43 = vpop.f32.mrf.mxu0  ;;  %v833_v45 = vpop.f32.mrf.mxu1  ;;  %v1157_v46 = vsel %vm716_vm3, %v3963_v41, -inf }
 0x2e3   : > { %v1134_v49 = vmul.f32 0.25, %v833_v45  ;;  %1158 = vmax.xlane.f32.xlu0 %v1157_v46  ;;  %v714_v45 = vsub.f32 1.0, %v3241_v4 }
 0x2e4   : > { %v3366_v56 = vpop.f32.mrf.mxu0  ;;  %v3371_v58 = vpop.f32.mrf.mxu1 }
 0x2e5   : > { %v3975_v59 = vsel %vm3969_vm6, -1e+30, %v1134_v49 }
 0x2e6   : > { %v836_v60 = vpop.f32.mrf.mxu1  ;;  %v882_v61 = vpop.f32.mrf.mxu0  ;;  %v1160_v62 = vsel %vm716_vm3, %v3975_v59, -inf }
 0x2e7   : > { %v1135_v54 = vmul.f32 0.25, %v882_v61  ;;  %1161 = vmax.xlane.f32.xlu1 %v1160_v62 }
 0x2e8   : > { %v3372_v0 = vpop.f32.mrf.mxu1  ;;  %v3377_v1 = vpop.f32.mrf.mxu0 }
 0x2e9   : > { %v3987_v2 = vsel %vm3981_vm7, -1e+30, %v1135_v54  ;;  %v735_v0 = vsel %vm716_vm3, %v714_v45, 0.0 }
 0x2ea   : > { %v885_v5 = vpop.f32.mrf.mxu0  ;;  %v931_v6 = vpop.f32.mrf.mxu1  ;;  %v1163_v7 = vsel %vm716_vm3, %v3987_v2, -inf }
 0x2eb   : > { %v1136_v8 = vmul.f32 0.25, %v931_v6  ;;  %1164 = vmax.xlane.f32.xlu0 %v1163_v7 }
 0x2ec   : > { %v3378_v9 = vpop.f32.mrf.mxu0  ;;  %v3383_v10 = vpop.f32.mrf.mxu1 }
 0x2ed   : > { %v3999_v11 = vsel %vm3993_vm8, -1e+30, %v1136_v8  ;;  %v715_v8 = vsub.f32 1.0, %v3242_v24  ;;  %v4049_v10 = vpop.xlane.xlu1 %730 }
 0x2ee   : > { %v934_v12 = vpop.f32.mrf.mxu1  ;;  %v980_v13 = vpop.f32.mrf.mxu0  ;;  %v1166_v14 = vsel %vm716_vm3, %v3999_v11, -inf }
 0x2ef   : > { %v1137_v57 = vmul.f32 0.25, %v980_v13  ;;  %1167 = vmax.xlane.f32.xlu0 %v1166_v14  ;;  %v738_v9 = vsel %vm716_vm3, %v715_v8, 0.0  ;;  %v4051_v12 = vpop.xlane.xlu0 %733 }
 0x2f0   : > { %v3384_v16 = vpop.f32.mrf.mxu1  ;;  %v3389_v17 = vpop.f32.mrf.mxu0 }
 0x2f1   : > { %v4012_v18 = vsel %vm4005_vm9, -1e+30, %v1137_v57  ;;  %v4053_v13 = vpop.permute.xlu1 %1382 }
 0x2f2   : > { %v983_v19 = vpop.f32.mrf.mxu0  ;;  %v1029_v20 = vpop.f32.mrf.mxu1  ;;  %v1169_v21 = vsel %vm716_vm3, %v4012_v18, -inf }
 0x2f3   : > { %v1138_v22 = vmul.f32 0.25, %v1029_v20  ;;  %1170 = vmax.xlane.f32.xlu1 %v1169_v21 }
 0x2f4   : > { %v3390_v26 = vpop.f32.mrf.mxu0  ;;  %v3395_v27 = vpop.f32.mrf.mxu1 }
 0x2f5   : > { %v1154_v28 = vsel %vm4016_vm10, -1e+30, %v1138_v22 }
 0x2f6   : > { %v1032_v29 = vpop.f32.mrf.mxu1  ;;  %v1078_v32 = vpop.f32.mrf.mxu0  ;;  %v1172_v33 = vsel %vm716_vm3, %v1154_v28, -inf }
 0x2f7   : > { %v1139_v37 = vmul.f32 0.25, %v1078_v32  ;;  %1173 = vmax.xlane.f32.xlu0 %v1172_v33 }
 0x2f8   : > { %v3396_v39 = vpop.f32.mrf.mxu1  ;;  %v3401_v43 = vpop.f32.mrf.mxu0 }
 0x2f9   : > { %v4029_v46 = vsel %vm4023_vm11, -1e+30, %v1139_v37 }
 0x2fa   : > { %v1081_v49 = vpop.f32.mrf.mxu0  ;;  %v1127_v56 = vpop.f32.mrf.mxu1  ;;  %v1175_v58 = vsel %vm716_vm3, %v4029_v46, -inf }
 0x2fb   : > { %v1140_v61 = vmul.f32 0.25, %v1127_v56  ;;  %1176 = vmax.xlane.f32.xlu1 %v1175_v58 }
 0x2fc   : > { %v3402_v62 = vpop.f32.mrf.mxu0  ;;  %v3407_v54 = vpop.f32.mrf.mxu1 }
 0x2fd   : > { %v4040_v1 = vsel %vm4033_vm12, -1e+30, %v1140_v61 }
 0x2fe   : > { %v1130_v5 = vpop.f32.mrf.mxu1  ;;  %v1178_v6 = vsel %vm716_vm3, %v4040_v1, -inf }
 0x2ff   : > { %736 = vadd.xlane.f32.xlu1 %v735_v0  ;;  %1179 = vmax.xlane.f32.xlu0 %v1178_v6 }
 0x300   : > { %v3408_v7 = vpop.f32.mrf.mxu1 }
 0x310   : > { %1478 = vrot.lane.b32.xlu1 %v3840_v47, %s3715_s24 }
 0x315   : > { %1430 = vrot.lane.b32.xlu0 %v3833_v42, %s3715_s24 }
 0x334   : > { %739 = vadd.xlane.f32.xlu0 %v738_v9 }
 0x36c   : > { %v1159_v14 = vpop.xlane.xlu0 %1158 }
 0x36d   : > { %v1181_v57 = vsub.f32 %v3963_v41, %v1159_v14 }
 0x36f   : > { %v1189_v15 = vmul.f32 1.442695, %v1181_v57 }
 0x370   : > { %v1162_v16 = vpop.xlane.xlu1 %1161 }
 0x371   : > { %3640 = vpow2.f32 %v1189_v15  ;;  %v1182_v17 = vsub.f32 %v3975_v59, %v1162_v16 }
 0x373   : > { %v1191_v19 = vmul.f32 1.442695, %v1182_v17 }
 0x374   : > { %v1165_v20 = vpop.xlane.xlu0 %1164 }
 0x375   : > { %3642 = vpow2.f32 %v1191_v19  ;;  %v1183_v21 = vsub.f32 %v3987_v2, %v1165_v20 }
 0x377   : > { %v1193_v4 = vmul.f32 1.442695, %v1183_v21 }
 0x378   : > { %v1168_v22 = vpop.xlane.xlu0 %1167 }
 0x379   : > { %3644 = vpow2.f32 %v1193_v4  ;;  %v1184_v26 = vsub.f32 %v3999_v11, %v1168_v22 }
 0x37b   : > { %v1195_v27 = vmul.f32 1.442695, %v1184_v26 }
 0x37c   : > { %v1171_v29 = vpop.xlane.xlu1 %1170 }
 0x37d   : > { %3646 = vpow2.f32 %v1195_v27  ;;  %v1185_v41 = vsub.f32 %v4012_v18, %v1171_v29 }
 0x37e   : > { %v4060_v32 = vpop.eup %3640 }
 0x37f   : > { %v1197_v33 = vmul.f32 1.442695, %v1185_v41  ;;  %v1205_v59 = vsel %vm716_vm3, %v4060_v32, 0.0 }
 0x380   : > { %1206 = vadd.xlane.f32.xlu1 %v1205_v59  ;;  %v1174_v24 = vpop.xlane.xlu0 %1173 }
 0x381   : > { %3648 = vpow2.f32 %v1197_v33  ;;  %v1186_v2 = vsub.f32 %v1154_v28, %v1174_v24  ;;  %v1388_v33 = vsel %vm1290_vm4, %v4053_v13, 0 }
 0x382   : > { %v4064_v37 = vpop.eup %3642 }
 0x383   : > { %v1199_v39 = vmul.f32 1.442695, %v1186_v2  ;;  %v1208_v11 = vsel %vm716_vm3, %v4064_v37, 0.0 }
 0x384   : > { %1209 = vadd.xlane.f32.xlu0 %v1208_v11  ;;  %v1177_v62 = vpop.xlane.xlu1 %1176 }
 0x385   : > { %3650 = vpow2.f32 %v1199_v39  ;;  %v1187_v0 = vsub.f32 %v4029_v46, %v1177_v62 }
 0x386   : > { %v4068_v43 = vpop.eup %3644 }
 0x387   : > { %v1211_v18 = vsel %vm716_vm3, %v4068_v43, 0.0  ;;  %v1201_v6 = vmul.f32 1.442695, %v1187_v0 }
 0x388   : > { %1212 = vadd.xlane.f32.xlu1 %v1211_v18  ;;  %v1180_v54 = vpop.xlane.xlu0 %1179  ;;  %v4118_v46 = vpop.xlane.xlu1 %736 }
 0x389   : > { %v1188_v5 = vsub.f32 %v4040_v1, %v1180_v54  ;;  %3652 = vpow2.f32 %v1201_v6 }
 0x38a   : > { %v4072_v45 = vpop.eup %3646 }
 0x38b   : > { %v1214_v49 = vsel %vm716_vm3, %v4072_v45, 0.0  ;;  %v1203_v7 = vmul.f32 1.442695, %v1188_v5 }
 0x38c   : > { %1215 = vadd.xlane.f32.xlu0 %v1214_v49  ;;  %v1431_v1 = vpop.permute.xlu0 %1430  ;;  %v1479_v15 = vpop.permute.xlu1 %1478 }
 0x38d   : > { %3654 = vpow2.f32 %v1203_v7  ;;  %v1436_v13 = vsel %vm1290_vm4, %v1431_v1, 0 }
 0x38e   : > { %v4076_v28 = vpop.eup %3648 }
 0x38f   : > { %v1217_v56 = vsel %vm716_vm3, %v4076_v28, 0.0 }
 0x390   : > { %1218 = vadd.xlane.f32.xlu1 %v1217_v56 }
 0x392   : > { %v4080_v58 = vpop.eup %3650 }
 0x393   : > { %v1220_v61 = vsel %vm716_vm3, %v4080_v58, 0.0 }
 0x394   : > { %1221 = vadd.xlane.f32.xlu0 %v1220_v61 }
 0x396   : > { %v4092_v8 = vpop.eup %3652 }
 0x397   : > { %v1223_v57 = vsel %vm716_vm3, %v4092_v8, 0.0 }
 0x39a   : > { %v4094_v9 = vpop.eup %3654 }
 0x39b   : > { %v1226_v14 = vsel %vm716_vm3, %v4094_v9, 0.0 }
 0x3a1   : > { %1574 = vrot.lane.b32.xlu1 %v3843_v50, %s3715_s24 }
 0x3a5   : > { %1622 = vrot.lane.b32.xlu1 %v3849_v52, %s3715_s24 }
 0x3aa   : > { %1526 = vrot.lane.b32.xlu0 %v3845_v51, %s3715_s24 }
 0x3bd   : > { %v4120_v16 = vpop.xlane.xlu0 %739 }
 0x3c9   : > { %1227 = vadd.xlane.f32.xlu0 %v1226_v14  ;;  %1224 = vadd.xlane.f32.xlu1 %v1223_v57 }
 0x3da   : > { %1722 = vrot.lane.b32.xlu1 %v3836_v44, %s3716_s25 }
 0x3de   : > { %1720 = vrot.lane.b32.xlu1 %v3836_v44, %s3717_s27 }
 0x3df   : > { %1672 = vrot.lane.b32.xlu0 %v3830_v40, %s3716_s25 }
 0x3e2   : > { %1822 = vrot.lane.b32.xlu1 %v3833_v42, %s3716_s25 }
 0x3e3   : > { %1670 = vrot.lane.b32.xlu0 %v3830_v40, %s3717_s27 }
 0x3e6   : > { %1820 = vrot.lane.b32.xlu1 %v3833_v42, %s3717_s27 }
 0x3e7   : > { %1772 = vrot.lane.b32.xlu0 %v3828_v38, %s3716_s25 }
 0x3ea   : > { %1922 = vrot.lane.b32.xlu1 %v3845_v51, %s3716_s25 }
 0x3eb   : > { %1770 = vrot.lane.b32.xlu0 %v3828_v38, %s3717_s27 }
 0x3ee   : > { %1920 = vrot.lane.b32.xlu1 %v3845_v51, %s3717_s27 }
 0x3ef   : > { %1872 = vrot.lane.b32.xlu0 %v3840_v47, %s3716_s25 }
 0x3f2   : > { %2022 = vrot.lane.b32.xlu1 %v3849_v52, %s3716_s25 }
 0x3f3   : > { %1870 = vrot.lane.b32.xlu0 %v3840_v47, %s3717_s27 }
 0x3f6   : > { %2020 = vrot.lane.b32.xlu1 %v3849_v52, %s3717_s27 }
 0x3f7   : > { %1972 = vrot.lane.b32.xlu0 %v3843_v50, %s3716_s25 }
 0x3fa   : > { %2190 = vrot.lane.b32.xlu1 %v3830_v40, %s3718_s28 }
 0x3fb   : > { %1970 = vrot.lane.b32.xlu0 %v3843_v50, %s3717_s27 }
 0x409   : > { %v1207_v17 = vpop.xlane.xlu1 %1206 }
 0x40a   : > { %3656 = vrcp.f32 %v1207_v17 }
 0x40d   : > { %v1210_v19 = vpop.xlane.xlu0 %1209 }
 0x40e   : > { %3658 = vrcp.f32 %v1210_v19 }
 0x411   : > { %v1213_v20 = vpop.xlane.xlu1 %1212 }
 0x412   : > { %3660 = vrcp.f32 %v1213_v20 }
 0x415   : > { %v1216_v21 = vpop.xlane.xlu0 %1215 }
 0x416   : > { %3662 = vrcp.f32 %v1216_v21 }
 0x417   : > { %v3657_v4 = vpop.eup %3656 }
 0x418   : > { %v1230_v22 = vmul.f32 %v3657_v4, %v4060_v32 }
 0x419   : > { %v1219_v40 = vpop.xlane.xlu1 %1218 }
 0x41a   : > { %3664 = vrcp.f32 %v1219_v40  ;;  %v1269_v26 = vsel %vm1245_vm13, 0.0, %v1230_v22 }
 0x41b   : > { %v3659_v27 = vpop.eup %3658  ;;  %v1277_v29 = vpack.c.bf16 %v1269_v26, %v1269_v26 }
 0x41c   : > { %v1232_v41 = vmul.f32 %v3659_v27, %v4064_v37 }
 0x41d   : > { %v1222_v59 = vpop.xlane.xlu0 %1221  ;;  %3412 = vmatmul.mubr.msk.bf16.vlgmr.msra.gmra.mxu0 %vm716_vm3, %v1277_v29  ;;  %v1575_v0 = vpop.permute.xlu1 %1574 }
 0x41e   : > { %3666 = vrcp.f32 %v1222_v59  ;;  %3422 = vmatpush3.bf16.msra.mxu0 %v1388_v33  ;;  %v1270_v32 = vsel %vm1246_vm14, 0.0, %v1232_v41  ;;  %3423 = vmatprep.mubr.msk.bf16.mxu0 %vm3713_vm2, %v3712_v36 }
 0x41f   : > { %v3661_v24 = vpop.eup %3660  ;;  %v1278_v2 = vpack.c.bf16 %v1270_v32, %v1270_v32  ;;  %3433 = vmatprep.subr.bf16.mxu0 %v3712_v36 }
 0x420   : > { %v1234_v37 = vmul.f32 %v3661_v24, %v4068_v43  ;;  %v1484_v43 = vsel %vm1290_vm4, %v1479_v15, 0 }
 0x421   : > { %3418 = vmatmul.mubr.msk.bf16.vlgmr.msra.gmra.mxu1 %vm716_vm3, %v1278_v2  ;;  %v1527_v56 = vpop.permute.xlu0 %1526  ;;  %v1623_v1 = vpop.permute.xlu1 %1622 }
 0x422   : > { %3428 = vmatpush3.bf16.msra.mxu1 %v1436_v13  ;;  %v1271_v39 = vsel %vm4486_vm15, 0.0, %v1234_v37  ;;  %3429 = vmatprep.mubr.msk.bf16.mxu1 %vm3713_vm2, %v3712_v36  ;;  %vm4489_vm15 = vcmp.lt.f32.partialorder %v4049_v10, 0.5  ;;  %v1532_v5 = vsel %vm1290_vm4, %v1527_v56, 0  ;;  %v1628_v19 = vsel %vm1290_vm4, %v1623_v1, 0 }
 0x423   : > { %v3663_v11 = vpop.eup %3662  ;;  %v1279_v18 = vpack.c.bf16 %v1271_v39, %v1271_v39  ;;  %3439 = vmatprep.subr.bf16.mxu1 %v3712_v36 }
 0x424   : > { %v1236_v49 = vmul.f32 %v3663_v11, %v4072_v45 }
 0x425   : > { %3424 = vmatmul.mubr.msk.bf16.vlgmr.msra.gmra.mxu0 %vm716_vm3, %v1279_v18 }
 0x426   : > { %3434 = vmatpush3.bf16.msra.mxu0 %v1484_v43  ;;  %v1272_v61 = vsel %vm4487_vm1, 0.0, %v1236_v49  ;;  %3435 = vmatprep.mubr.msk.bf16.mxu0 %vm3713_vm2, %v3712_v36  ;;  %vm4488_vm1 = vcmp.lt.f32.partialorder %v4051_v12, 0.5 }
 0x427   : > { %v3665_v62 = vpop.eup %3664  ;;  %v1280_v54 = vpack.c.bf16 %v1272_v61, %v1272_v61  ;;  %3445 = vmatprep.subr.bf16.mxu0 %v3712_v36 }
 0x428   : > { %v1238_v45 = vmul.f32 %v3665_v62, %v4076_v28  ;;  %v1580_v28 = vsel %vm1290_vm4, %v1575_v0, 0 }
 0x429   : > { %3430 = vmatmul.mubr.msk.bf16.vlgmr.msra.gmra.mxu1 %vm716_vm3, %v1280_v54 }
 0x42a   : > { %3440 = vmatpush3.bf16.msra.mxu1 %v1532_v5  ;;  %v1273_v6 = vsel %vm4489_vm15, 0.0, %v1238_v45  ;;  %3441 = vmatprep.mubr.msk.bf16.mxu1 %vm3713_vm2, %v3712_v36  ;;  %vm1251_vm15 = vcmp.lt.f32.partialorder %v4118_v46, 0.5  ;;  %v3634_v46 = vld [vmem:[%s4478_s6 + $0x8] sm:$0xff]  }
 0x42b   : > { %v3667_v7 = vpop.eup %3666  ;;  %v1281_v14 = vpack.c.bf16 %v1273_v6, %v1273_v6  ;;  %3451 = vmatprep.subr.bf16.mxu1 %v3712_v36 }
 0x42c   : > { %v1240_v57 = vmul.f32 %v3667_v7, %v4080_v58 }
 0x42d   : > { %3436 = vmatmul.mubr.msk.bf16.vlgmr.msra.gmra.mxu0 %vm716_vm3, %v1281_v14 }
 0x42e   : > { %3446 = vmatpush3.bf16.msra.mxu0 %v1580_v28  ;;  %v1274_v15 = vsel %vm4488_vm1, 0.0, %v1240_v57  ;;  %3447 = vmatprep.mubr.msk.bf16.mxu0 %vm3713_vm2, %v3712_v36  ;;  %vm1252_vm1 = vcmp.lt.f32.partialorder %v4120_v16, 0.5  ;;  %v3635_v16 = vld [vmem:[%s4478_s6] sm:$0xff]  }
 0x42f   : > { %v1282_v17 = vpack.c.bf16 %v1274_v15, %v1274_v15  ;;  %3457 = vmatprep.subr.bf16.mxu0 %v3712_v36 }
 0x431   : > { %3442 = vmatmul.mubr.msk.bf16.vlgmr.msra.gmra.mxu1 %vm716_vm3, %v1282_v17 }
 0x432   : > { %3452 = vmatpush3.bf16.msra.mxu1 %v1628_v19  ;;  %3453 = vmatprep.mubr.msk.bf16.mxu1 %vm3713_vm2, %v3712_v36 }
 0x433   : > { %3463 = vmatprep.subr.bf16.mxu1 %v3712_v36 }
 0x452   : > { %v1228_v58 = vpop.xlane.xlu0 %1227  ;;  %v1225_v20 = vpop.xlane.xlu1 %1224 }
 0x453   : > { %3668 = vrcp.f32 %v1228_v58 }
 0x454   : > { %3670 = vrcp.f32 %v1225_v20 }
 0x456   : > { %v1723_v21 = vpop.permute.xlu1 %1722  ;;  %v1673_v4 = vpop.permute.xlu0 %1672 }
 0x457   : > { %v1728_v13 = vsel %vm500_vm0, %v1723_v21, 0 }
 0x45a   : > { %v1721_v22 = vpop.permute.xlu1 %1720  ;;  %v1671_v40 = vpop.permute.xlu0 %1670 }
 0x45e   : > { %v1823_v27 = vpop.permute.xlu1 %1822  ;;  %v1773_v32 = vpop.permute.xlu0 %1772 }
 0x45f   : > { %v1828_v18 = vsel %vm500_vm0, %v1823_v27, 0  ;;  %v1778_v49 = vsel %vm500_vm0, %v1773_v32, 0 }
 0x460   : > { %v3669_v26 = vpop.eup %3668 }
 0x461   : > { %v3671_v29 = vpop.eup %3670  ;;  %v1244_v41 = vmul.f32 %v3669_v26, %v4094_v9  ;;  %v1678_v9 = vsel %vm500_vm0, %v1673_v4, 0 }
 0x462   : > { %v1242_v33 = vmul.f32 %v3671_v29, %v4092_v8  ;;  %v1821_v39 = vpop.permute.xlu1 %1820  ;;  %v1771_v8 = vpop.permute.xlu0 %1770 }
 0x463   : > { %v1276_v59 = vsel %vm1252_vm1, 0.0, %v1244_v41 }
 0x464   : > { %v1275_v24 = vsel %vm1251_vm15, 0.0, %v1242_v33  ;;  %v1284_v2 = vpack.c.bf16 %v1276_v59, %v1276_v59 }
 0x465   : > { %v1283_v37 = vpack.c.bf16 %v1275_v24, %v1275_v24 }
 0x466   : > { %3454 = vmatmul.mubr.msk.bf16.vlgmr.msra.gmra.mxu1 %vm716_vm3, %v1284_v2  ;;  %v1923_v11 = vpop.permute.xlu1 %1922  ;;  %v1873_v43 = vpop.permute.xlu0 %1872 }
 0x467   : > { %3448 = vmatmul.mubr.msk.bf16.vlgmr.msra.gmra.mxu0 %vm716_vm3, %v1283_v37  ;;  %3464 = vmatpush3.bf16.xpose.msra.mxu1 %v1728_v13  ;;  %v1928_v61 = vsel %vm500_vm0, %v1923_v11, 0  ;;  %v1878_v54 = vsel %vm500_vm0, %v1873_v43, 0 }
 0x468   : > { %3458 = vmatpush3.bf16.xpose.msra.mxu0 %v1678_v9  ;;  %3459 = vmatprep.mubr.msk.bf16.mxu0 %vm3713_vm2, %v3712_v36 }
 0x469   : > { %3465 = vmatprep.mubr.msk.bf16.mxu1 %vm3713_vm2, %v3712_v36  ;;  %3469 = vmatprep.subr.bf16.mxu0 %v3712_v36 }
 0x46a   : > { %3475 = vmatprep.subr.bf16.mxu1 %v3712_v36  ;;  %v1921_v56 = vpop.permute.xlu1 %1920  ;;  %v1871_v62 = vpop.permute.xlu0 %1870 }
 0x46e   : > { %3466 = vmatmul.mubr.msk.bf16.vlgmr.msra.gmra.mxu1 %vm500_vm0, %v1721_v22  ;;  %v2023_v0 = vpop.permute.xlu1 %2022  ;;  %v1973_v45 = vpop.permute.xlu0 %1972 }
 0x46f   : > { %3460 = vmatmul.mubr.msk.bf16.vlgmr.msra.gmra.mxu0 %vm500_vm0, %v1671_v40  ;;  %3476 = vmatpush3.bf16.xpose.msra.mxu1 %v1828_v18  ;;  %v2028_v5 = vsel %vm500_vm0, %v2023_v0, 0  ;;  %v1978_v7 = vsel %vm500_vm0, %v1973_v45, 0 }
 0x470   : > { %3470 = vmatpush3.bf16.xpose.msra.mxu0 %v1778_v49  ;;  %3471 = vmatprep.mubr.msk.bf16.mxu0 %vm3713_vm2, %v3712_v36 }
 0x471   : > { %3477 = vmatprep.mubr.msk.bf16.mxu1 %vm3713_vm2, %v3712_v36  ;;  %3481 = vmatprep.subr.bf16.mxu0 %v3712_v36 }
 0x472   : > { %3487 = vmatprep.subr.bf16.mxu1 %v3712_v36  ;;  %v2021_v6 = vpop.permute.xlu1 %2020  ;;  %v1971_v57 = vpop.permute.xlu0 %1970 }
 0x476   : > { %3478 = vmatmul.mubr.msk.bf16.vlgmr.msra.gmra.mxu1 %vm500_vm0, %v1821_v39  ;;  %v2191_v14 = vpop.permute.xlu1 %2190 }
 0x477   : > { %3472 = vmatmul.mubr.msk.bf16.vlgmr.msra.gmra.mxu0 %vm500_vm0, %v1771_v8  ;;  %3488 = vmatpush3.bf16.xpose.msra.mxu1 %v1928_v61  ;;  %v2196_v28 = vsel %vm1290_vm4, %v2191_v14, 0 }
 0x478   : > { %3482 = vmatpush3.bf16.xpose.msra.mxu0 %v1878_v54  ;;  %3483 = vmatprep.mubr.msk.bf16.mxu0 %vm3713_vm2, %v3712_v36 }
 0x479   : > { %3489 = vmatprep.mubr.msk.bf16.mxu1 %vm3713_vm2, %v3712_v36  ;;  %3493 = vmatprep.subr.bf16.mxu0 %v3712_v36 }
 0x47a   : > { %3499 = vmatprep.subr.bf16.mxu1 %v3712_v36 }
 0x47e   : > { %3490 = vmatmul.mubr.msk.bf16.vlgmr.msra.gmra.mxu1 %vm500_vm0, %v1921_v56 }
 0x47f   : > { %3484 = vmatmul.mubr.msk.bf16.vlgmr.msra.gmra.mxu0 %vm500_vm0, %v1871_v62  ;;  %3500 = vmatpush3.bf16.xpose.msra.mxu1 %v2028_v5 }
 0x480   : > { %3494 = vmatpush3.bf16.xpose.msra.mxu0 %v1978_v7  ;;  %3495 = vmatprep.mubr.msk.bf16.mxu0 %vm3713_vm2, %v3712_v36 }
 0x481   : > { %3501 = vmatprep.mubr.msk.bf16.mxu1 %vm3713_vm2, %v3712_v36  ;;  %3505 = vmatprep.subr.bf16.mxu0 %v3712_v36 }
 0x482   : > { %3511 = vmatprep.subr.bf16.mxu1 %v3712_v36 }
 0x486   : > { %3502 = vmatmul.mubr.msk.bf16.vlgmr.msra.gmra.mxu1 %vm500_vm0, %v2021_v6 }
 0x487   : > { %3496 = vmatmul.mubr.msk.bf16.vlgmr.msra.gmra.mxu0 %vm500_vm0, %v1971_v57  ;;  %3513 = vmatprep.mubr.msk.bf16.mxu1 %vm3713_vm2, %v3712_v36 }
 0x488   : > { %3506 = vmatpush3.bf16.msra.mxu0 %v2196_v28  ;;  %3507 = vmatprep.mubr.msk.bf16.mxu0 %vm3713_vm2, %v3712_v36 }
 0x489   : > { %3517 = vmatprep.subr.bf16.mxu0 %v3712_v36 }
 0x4dd   : > { %v4233_v1 = vpop.f32.mrf.mxu0 }
 0x4df   : > { %v3413_v15 = vpop.f32.mrf.mxu0 }
 0x4e1   : > { %v1331_v17 = vpop.f32.mrf.mxu0  ;;  %v4235_v19 = vpop.f32.mrf.mxu1 }
 0x4e3   : > { %v3414_v58 = vpop.f32.mrf.mxu0  ;;  %v3419_v20 = vpop.f32.mrf.mxu1 }
 0x4e5   : > { %v1379_v21 = vpop.f32.mrf.mxu1  ;;  %v4237_v4 = vpop.f32.mrf.mxu0 }
 0x4e7   : > { %v3420_v22 = vpop.f32.mrf.mxu1  ;;  %v3425_v40 = vpop.f32.mrf.mxu0 }
 0x4e9   : > { %v1427_v26 = vpop.f32.mrf.mxu0  ;;  %v4239_v27 = vpop.f32.mrf.mxu1 }
 0x4eb   : > { %v3426_v29 = vpop.f32.mrf.mxu0  ;;  %v3431_v41 = vpop.f32.mrf.mxu1 }
 0x4ed   : > { %v1475_v33 = vpop.f32.mrf.mxu1  ;;  %v4241_v59 = vpop.f32.mrf.mxu0 }
 0x4ef   : > { %v3432_v32 = vpop.f32.mrf.mxu1  ;;  %v3437_v24 = vpop.f32.mrf.mxu0 }
 0x4f1   : > { %v1523_v2 = vpop.f32.mrf.mxu0  ;;  %v4243_v37 = vpop.f32.mrf.mxu1 }
 0x4f3   : > { %v3438_v13 = vpop.f32.mrf.mxu0  ;;  %v3443_v39 = vpop.f32.mrf.mxu1 }
 0x4f5   : > { %v1571_v9 = vpop.f32.mrf.mxu1 }
 0x4f7   : > { %v3444_v8 = vpop.f32.mrf.mxu1 }
 0x526   : > { %v4245_v11 = vpop.f32.mrf.mxu1 }
 0x527   : > { %v4247_v18 = vpop.f32.mrf.mxu0 }
 0x528   : > { %v3455_v49 = vpop.f32.mrf.mxu1 }
 0x529   : > { %v3449_v43 = vpop.f32.mrf.mxu0 }
 0x52a   : > { %v1667_v56 = vpop.f32.mrf.mxu1 }
 0x52b   : > { %v1619_v61 = vpop.f32.mrf.mxu0 }
 0x52c   : > { %v3456_v62 = vpop.f32.mrf.mxu1 }
 0x52d   : > { %v3450_v54 = vpop.f32.mrf.mxu0 }
 0x52e   : > { %v1764_v0 = vpop.f32.mrf.mxu1 }
 0x52f   : > { %v1714_v45 = vpop.f32.mrf.mxu0  ;;  %v2071_v5 = vmul.f32 0.25, %v1764_v0 }
 0x530   : > { %v2070_v6 = vmul.f32 0.25, %v1714_v45  ;;  %v3467_v7 = vpop.f32.mrf.mxu1 }
 0x531   : > { %v3461_v14 = vpop.f32.mrf.mxu0  ;;  %v4251_v57 = vsel %vm3969_vm6, -1e+30, %v2071_v5  ;;  %vm4507_vm6 = vcmp.lt.f32.partialorder %v3944_v25, 0.5 }
 0x532   : > { %v1767_v28 = vpop.f32.mrf.mxu1  ;;  %v4255_v15 = vsel %vm3957_vm5, -1e+30, %v2070_v6  ;;  %v2089_v17 = vsel %vm716_vm3, %v4251_v57, -inf  ;;  %vm4506_vm5 = vcmp.lt.f32.partialorder %v3951_v31, 0.5 }
 0x533   : > { %v1717_v58 = vpop.f32.mrf.mxu0  ;;  %v2086_v20 = vsel %vm716_vm3, %v4255_v15, -inf  ;;  %2090 = vmax.xlane.f32.xlu1 %v2089_v17 }
 0x534   : > { %2087 = vmax.xlane.f32.xlu0 %v2086_v20  ;;  %v3468_v21 = vpop.f32.mrf.mxu1 }
 0x535   : > { %v3462_v22 = vpop.f32.mrf.mxu0 }
 0x536   : > { %v1864_v40 = vpop.f32.mrf.mxu1 }
 0x537   : > { %v1814_v48 = vpop.f32.mrf.mxu0  ;;  %v2073_v29 = vmul.f32 0.25, %v1864_v40 }
 0x538   : > { %v2072_v26 = vmul.f32 0.25, %v1814_v48  ;;  %v3479_v41 = vpop.f32.mrf.mxu1 }
 0x539   : > { %v3473_v33 = vpop.f32.mrf.mxu0  ;;  %v2081_v39 = vsel %vm3993_vm8, -1e+30, %v2073_v29  ;;  %vm4509_vm8 = vcmp.lt.f32.partialorder %v4051_v12, 0.5 }
 0x53a   : > { %v1867_v35 = vpop.f32.mrf.mxu1  ;;  %v2080_v32 = vsel %vm3981_vm7, -1e+30, %v2072_v26  ;;  %v2095_v56 = vsel %vm716_vm3, %v2081_v39, -inf  ;;  %vm4508_vm7 = vcmp.lt.f32.partialorder %v4049_v10, 0.5 }
 0x53b   : > { %v1817_v24 = vpop.f32.mrf.mxu0  ;;  %v2092_v2 = vsel %vm716_vm3, %v2080_v32, -inf }
 0x53c   : > { %2093 = vmax.xlane.f32.xlu0 %v2092_v2  ;;  %v3480_v13 = vpop.f32.mrf.mxu1 }
 0x53d   : > { %v3474_v9 = vpop.f32.mrf.mxu0 }
 0x53e   : > { %v1964_v8 = vpop.f32.mrf.mxu1 }
 0x53f   : > { %v1914_v49 = vpop.f32.mrf.mxu0  ;;  %v2075_v43 = vmul.f32 0.25, %v1964_v8 }
 0x540   : > { %v2074_v61 = vmul.f32 0.25, %v1914_v49  ;;  %2096 = vmax.xlane.f32.xlu0 %v2095_v56  ;;  %v3491_v62 = vpop.f32.mrf.mxu1 }
 0x541   : > { %v3485_v54 = vpop.f32.mrf.mxu0  ;;  %v4269_v53 = vsel %vm4016_vm10, -1e+30, %v2075_v43 }
 0x542   : > { %v1967_v0 = vpop.f32.mrf.mxu1  ;;  %v4273_v45 = vsel %vm4005_vm9, -1e+30, %v2074_v61  ;;  %v2101_v63 = vsel %vm716_vm3, %v4269_v53, -inf }
 0x543   : > { %v1917_v5 = vpop.f32.mrf.mxu0  ;;  %v2098_v6 = vsel %vm716_vm3, %v4273_v45, -inf }
 0x544   : > { %2099 = vmax.xlane.f32.xlu1 %v2098_v6  ;;  %2102 = vmax.xlane.f32.xlu0 %v2101_v63  ;;  %v3492_v7 = vpop.f32.mrf.mxu1 }
 0x545   : > { %v3486_v14 = vpop.f32.mrf.mxu0 }
 0x546   : > { %v2064_v28 = vpop.f32.mrf.mxu1 }
 0x547   : > { %v2014_v3 = vpop.f32.mrf.mxu0  ;;  %v2077_v17 = vmul.f32 0.25, %v2064_v28 }
 0x548   : > { %v2076_v58 = vmul.f32 0.25, %v2014_v3  ;;  %v3503_v20 = vpop.f32.mrf.mxu1 }
 0x549   : > { %v3497_v21 = vpop.f32.mrf.mxu0  ;;  %v2085_v55 = vsel %vm4033_vm12, -1e+30, %v2077_v17 }
 0x54a   : > { %v2067_v22 = vpop.f32.mrf.mxu1  ;;  %v2084_v40 = vsel %vm4023_vm11, -1e+30, %v2076_v58  ;;  %v2107_v48 = vsel %vm716_vm3, %v2085_v55, -inf }
 0x54b   : > { %v2017_v26 = vpop.f32.mrf.mxu0  ;;  %v2104_v29 = vsel %vm716_vm3, %v2084_v40, -inf  ;;  %2108 = vmax.xlane.f32.xlu0 %v2107_v48 }
 0x54c   : > { %2105 = vmax.xlane.f32.xlu1 %v2104_v29  ;;  %v3504_v41 = vpop.f32.mrf.mxu1 }
 0x54d   : > { %v3498_v33 = vpop.f32.mrf.mxu0 }
 0x55d   : > { %2286 = vrot.lane.b32.xlu1 %v3828_v38, %s3718_s28 }
 0x561   : > { %2334 = vrot.lane.b32.xlu1 %v3833_v42, %s3718_s28  ;;  %2238 = vrot.lane.b32.xlu0 %v3836_v44, %s3718_s28 }
 0x5bc   : > { %v2091_v34 = vpop.xlane.xlu1 %2090 }
 0x5bd   : > { %v2088_v60 = vpop.xlane.xlu0 %2087  ;;  %v2111_v35 = vsub.f32 %v4251_v57, %v2091_v34 }
 0x5be   : > { %v2110_v24 = vsub.f32 %v4255_v15, %v2088_v60 }
 0x5bf   : > { %v2120_v2 = vmul.f32 1.442695, %v2111_v35 }
 0x5c0   : > { %v2118_v13 = vmul.f32 1.442695, %v2110_v24 }
 0x5c1   : > { %3672 = vpow2.f32 %v2120_v2 }
 0x5c2   : > { %3674 = vpow2.f32 %v2118_v13 }
 0x5c5   : > { %v2094_v9 = vpop.xlane.xlu0 %2093 }
 0x5c6   : > { %v2112_v8 = vsub.f32 %v2080_v32, %v2094_v9 }
 0x5c8   : > { %v2122_v49 = vmul.f32 1.442695, %v2112_v8 }
 0x5c9   : > { %v2097_v38 = vpop.xlane.xlu0 %2096 }
 0x5ca   : > { %3676 = vpow2.f32 %v2122_v49  ;;  %v2113_v43 = vsub.f32 %v2081_v39, %v2097_v38 }
 0x5cc   : > { %v2124_v42 = vmul.f32 1.442695, %v2113_v43 }
 0x5cd   : > { %v2103_v62 = vpop.xlane.xlu0 %2102  ;;  %v2100_v6 = vpop.xlane.xlu1 %2099 }
 0x5ce   : > { %v3673_v56 = vpop.eup %3672  ;;  %3678 = vpow2.f32 %v2124_v42  ;;  %v2114_v7 = vsub.f32 %v4273_v45, %v2100_v6  ;;  %v2115_v28 = vsub.f32 %v4269_v53, %v2103_v62 }
 0x5cf   : > { %v3675_v44 = vpop.eup %3674  ;;  %v2137_v61 = vsel %vm716_vm3, %v3673_v56, 0.0 }
 0x5d0   : > { %v2134_v57 = vsel %vm716_vm3, %v3675_v44, 0.0  ;;  %2138 = vadd.xlane.f32.xlu0 %v2137_v61  ;;  %v2126_v3 = vmul.f32 1.442695, %v2114_v7  ;;  %v2128_v58 = vmul.f32 1.442695, %v2115_v28 }
 0x5d1   : > { %2135 = vadd.xlane.f32.xlu1 %v2134_v57 }
 0x5d2   : > { %3680 = vpow2.f32 %v2126_v3 }
 0x5d3   : > { %3682 = vpow2.f32 %v2128_v58 }
 0x5d4   : > { %v2109_v15 = vpop.xlane.xlu0 %2108 }
 0x5d5   : > { %v2106_v14 = vpop.xlane.xlu1 %2105  ;;  %v2117_v20 = vsub.f32 %v2085_v55, %v2109_v15 }
 0x5d6   : > { %v2116_v17 = vsub.f32 %v2084_v40, %v2106_v14 }
 0x5d7   : > { %v4295_v54 = vpop.eup %3676  ;;  %v2132_v22 = vmul.f32 1.442695, %v2117_v20 }
 0x5d8   : > { %v2140_v32 = vsel %vm716_vm3, %v4295_v54, 0.0  ;;  %v2239_v0 = vpop.permute.xlu0 %2238  ;;  %v2130_v21 = vmul.f32 1.442695, %v2116_v17 }
 0x5d9   : > { %2141 = vadd.xlane.f32.xlu1 %v2140_v32  ;;  %v2244_v39 = vsel %vm1290_vm4, %v2239_v0, 0  ;;  %v2287_v29 = vpop.permute.xlu1 %2286 }
 0x5da   : > { %3512 = vmatpush3.bf16.msra.mxu1 %v2244_v39  ;;  %3684 = vpow2.f32 %v2130_v21  ;;  %v2292_v43 = vsel %vm1290_vm4, %v2287_v29, 0 }
 0x5db   : > { %v4300_v63 = vpop.eup %3678  ;;  %3523 = vmatprep.subr.bf16.mxu1 %v3712_v36  ;;  %3686 = vpow2.f32 %v2132_v22 }
 0x5dc   : > { %v2143_v5 = vsel %vm716_vm3, %v4300_v63, 0.0 }
 0x5dd   : > { %2144 = vadd.xlane.f32.xlu0 %v2143_v5  ;;  %v2335_v41 = vpop.permute.xlu1 %2334 }
 0x5de   : > { %v2340_v38 = vsel %vm1290_vm4, %v2335_v41, 0 }
 0x5ea   : > { %2430 = vrot.lane.b32.xlu1 %v3845_v51, %s3718_s28  ;;  %v4311_v51 = vpop.eup %3680 }
 0x5eb   : > { %v4313_v48 = vpop.eup %3682 }
 0x5ec   : > { %v4317_v45 = vpop.eup %3684  ;;  %v2149_v53 = vsel %vm716_vm3, %v4313_v48, 0.0 }
 0x5ed   : > { %v2152_v55 = vsel %vm716_vm3, %v4317_v45, 0.0  ;;  %v4323_v40 = vpop.eup %3686 }
 0x5ee   : > { %v2155_v26 = vsel %vm716_vm3, %v4323_v40, 0.0 }
 0x5f3   : > { %2382 = vrot.lane.b32.xlu0 %v3840_v47, %s3718_s28  ;;  %v2146_v47 = vsel %vm716_vm3, %v4311_v51, 0.0 }
 0x60e   : > { %2147 = vadd.xlane.f32.xlu1 %v2146_v47 }
 0x612   : > { %2150 = vadd.xlane.f32.xlu0 %v2149_v53  ;;  %2153 = vadd.xlane.f32.xlu1 %v2152_v55 }
 0x616   : > { %2156 = vadd.xlane.f32.xlu0 %v2155_v26 }
 0x623   : > { %2526 = vrot.lane.b32.xlu1 %v3849_v52, %s3718_s28 }
 0x62c   : > { %2478 = vrot.lane.b32.xlu0 %v3843_v50, %s3718_s28 }
 0x659   : > { %v2139_v33 = vpop.xlane.xlu0 %2138 }
 0x65a   : > { %3688 = vrcp.f32 %v2139_v33  ;;  %v2136_v34 = vpop.xlane.xlu1 %2135 }
 0x65b   : > { %3690 = vrcp.f32 %v2136_v34 }
 0x662   : > { %v2142_v60 = vpop.xlane.xlu1 %2141 }
 0x663   : > { %3692 = vrcp.f32 %v2142_v60 }
 0x666   : > { %v2145_v35 = vpop.xlane.xlu0 %2144  ;;  %v2431_v15 = vpop.permute.xlu1 %2430 }
 0x667   : > { %v3689_v24 = vpop.eup %3688  ;;  %3694 = vrcp.f32 %v2145_v35  ;;  %v2436_v31 = vsel %vm1290_vm4, %v2431_v15, 0 }
 0x668   : > { %v3691_v2 = vpop.eup %3690  ;;  %v2161_v13 = vmul.f32 %v3689_v24, %v3673_v56 }
 0x669   : > { %v2159_v9 = vmul.f32 %v3691_v2, %v3675_v44 }
 0x66a   : > { %v2175_v52 = vsel %vm1246_vm14, 0.0, %v2161_v13  ;;  %v2383_v42 = vpop.permute.xlu0 %2382 }
 0x66b   : > { %v2174_v50 = vsel %vm1245_vm13, 0.0, %v2159_v9  ;;  %v2183_v8 = vpack.c.bf16 %v2175_v52, %v2175_v52  ;;  %v2388_v57 = vsel %vm1290_vm4, %v2383_v42, 0 }
 0x66c   : > { %v2182_v49 = vpack.c.bf16 %v2174_v50, %v2174_v50 }
 0x66d   : > { %3514 = vmatmul.mubr.msk.bf16.vlgmr.msra.gmra.mxu1 %vm716_vm3, %v2183_v8 }
 0x66e   : > { %3508 = vmatmul.mubr.msk.bf16.vlgmr.msra.gmra.mxu0 %vm716_vm3, %v2182_v49  ;;  %3524 = vmatpush3.bf16.msra.mxu1 %v2340_v38 }
 0x66f   : > { %3518 = vmatpush3.bf16.msra.mxu0 %v2292_v43  ;;  %3519 = vmatprep.mubr.msk.bf16.mxu0 %vm3713_vm2, %v3712_v36 }
 0x670   : > { %v3693_v23 = vpop.eup %3692  ;;  %3529 = vmatprep.subr.bf16.mxu0 %v3712_v36  ;;  %3525 = vmatprep.mubr.msk.bf16.mxu1 %vm3713_vm2, %v3712_v36 }
 0x671   : > { %v2163_v30 = vmul.f32 %v3693_v23, %v4295_v54  ;;  %3535 = vmatprep.subr.bf16.mxu1 %v3712_v36 }
 0x673   : > { %v2176_v56 = vsel %vm4506_vm5, 0.0, %v2163_v30 }
 0x674   : > { %v3695_v44 = vpop.eup %3694  ;;  %v2184_v61 = vpack.c.bf16 %v2176_v56, %v2176_v56 }
 0x675   : > { %v2165_v62 = vmul.f32 %v3695_v44, %v4300_v63 }
 0x676   : > { %3520 = vmatmul.mubr.msk.bf16.vlgmr.msra.gmra.mxu0 %vm716_vm3, %v2184_v61 }
 0x677   : > { %3530 = vmatpush3.bf16.msra.mxu0 %v2388_v57  ;;  %v2177_v32 = vsel %vm4507_vm6, 0.0, %v2165_v62  ;;  %3531 = vmatprep.mubr.msk.bf16.mxu0 %vm3713_vm2, %v3712_v36  ;;  %v2719_v57 = vlaneseq }
 0x678   : > { %v2185_v54 = vpack.c.bf16 %v2177_v32, %v2177_v32  ;;  %3541 = vmatprep.subr.bf16.mxu0 %v3712_v36 }
 0x67a   : > { %3526 = vmatmul.mubr.msk.bf16.vlgmr.msra.gmra.mxu1 %vm716_vm3, %v2185_v54  ;;  %v2720_v54 = vshrl.u32 %v2719_v57, 7 }
 0x67b   : > { %3536 = vmatpush3.bf16.msra.mxu1 %v2436_v31  ;;  %3537 = vmatprep.mubr.msk.bf16.mxu1 %vm3713_vm2, %v3712_v36 }
 0x67c   : > { %3547 = vmatprep.subr.bf16.mxu1 %v3712_v36 }
 0x697   : > { %v2148_v0 = vpop.xlane.xlu1 %2147 }
 0x698   : > { %3696 = vrcp.f32 %v2148_v0 }
 0x69b   : > { %v2151_v25 = vpop.xlane.xlu0 %2150  ;;  %v2154_v39 = vpop.xlane.xlu1 %2153 }
 0x69c   : > { %3698 = vrcp.f32 %v2151_v25  ;;  %v2721_v25 = vsub.s32 0, %v2720_v54 }
 0x69d   : > { %3700 = vrcp.f32 %v2154_v39  ;;  %v2728_v39 = vsub.s32 1, %v2720_v54 }
 0x69f   : > { %v2157_v63 = vpop.xlane.xlu0 %2156  ;;  %v2527_v22 = vpop.permute.xlu1 %2526 }
 0x6a0   : > { %3702 = vrcp.f32 %v2157_v63  ;;  %v2532_v55 = vsel %vm1290_vm4, %v2527_v22, 0 }
 0x6a3   : > { %v2479_v7 = vpop.permute.xlu0 %2478 }
 0x6a4   : > { %v2484_v20 = vsel %vm1290_vm4, %v2479_v7, 0 }
 0x6a5   : > { %v3697_v5 = vpop.eup %3696 }
 0x6a6   : > { %v2167_v6 = vmul.f32 %v3697_v5, %v4311_v51 }
 0x6a8   : > { %v2178_v14 = vsel %vm4508_vm7, 0.0, %v2167_v6  ;;  %v2735_v6 = vsub.s32 2, %v2720_v54 }
 0x6a9   : > { %v3699_v28 = vpop.eup %3698  ;;  %v2186_v3 = vpack.c.bf16 %v2178_v14, %v2178_v14  ;;  %v2718_v14 = vld [vmem:[%s449_s19] sm:$0xff] }
 0x6aa   : > { %v3701_v17 = vpop.eup %3700  ;;  %v2169_v58 = vmul.f32 %v3699_v28, %v4313_v48  ;;  %v2736_v22 = vrot.slane %v2718_v14, %v2735_v6 }
 0x6ab   : > { %3532 = vmatmul.mubr.msk.bf16.vlgmr.msra.gmra.mxu0 %vm716_vm3, %v2186_v3  ;;  %v2171_v21 = vmul.f32 %v3701_v17, %v4317_v45  ;;  %v2722_v17 = vrot.slane %v2718_v14, %v2721_v25 }
 0x6ac   : > { %3542 = vmatpush3.bf16.msra.mxu0 %v2484_v20  ;;  %v2179_v51 = vsel %vm4509_vm8, 0.0, %v2169_v58  ;;  %3543 = vmatprep.mubr.msk.bf16.mxu0 %vm3713_vm2, %v3712_v36  ;;  %v2729_v58 = vrot.slane %v2718_v14, %v2728_v39  ;;  %v2742_v20 = vsub.s32 3, %v2720_v54 }
 0x6ad   : > { %v3703_v10 = vpop.eup %3702  ;;  %v2187_v47 = vpack.c.bf16 %v2179_v51, %v2179_v51  ;;  %v2180_v53 = vsel %vm1251_vm15, 0.0, %v2171_v21  ;;  %3553 = vmatprep.subr.bf16.mxu0 %v3634_v46  ;;  %v2749_v51 = vsub.s32 4, %v2720_v54 }
 0x6ae   : > { %v2173_v48 = vmul.f32 %v3703_v10, %v4323_v40  ;;  %v2188_v12 = vpack.c.bf16 %v2180_v53, %v2180_v53  ;;  %v2756_v53 = vsub.s32 5, %v2720_v54 }
 0x6af   : > { %3538 = vmatmul.mubr.msk.bf16.vlgmr.msra.gmra.mxu1 %vm716_vm3, %v2187_v47  ;;  %v2743_v47 = vrot.slane %v2718_v14, %v2742_v20 }
 0x6b0   : > { %3548 = vmatpush3.bf16.msra.mxu1 %v2532_v55  ;;  %3549 = vmatprep.mubr.msk.bf16.mxu1 %vm3713_vm2, %v3712_v36  ;;  %v2181_v45 = vsel %vm1252_vm1, 0.0, %v2173_v48  ;;  %v2750_v48 = vrot.slane %v2718_v14, %v2749_v51  ;;  %v2763_v55 = vsub.s32 6, %v2720_v54  ;;  %vm4510_vm1 = vcmask 261120  }
 0x6b1   : > { %v2189_v26 = vpack.c.bf16 %v2181_v45, %v2181_v45  ;;  %v2770_v45 = vsub.s32 7, %v2720_v54  ;;  %vm4511_vm2 = vmmov %vm4510_vm1 }
 0x6b2   : > { %vm4513_vm4 = vmmov %vm4510_vm1 }
 0x6b3   : > { %3544 = vmatmul.mubr.msk.bf16.vlgmr.msra.gmra.mxu0 %vm716_vm3, %v2188_v12  ;;  %v2757_v12 = vrot.slane %v2718_v14, %v2756_v53  ;;  %vm4514_vm12 = vmmov %vm4510_vm1 }
 0x6b4   : > { %3554 = vmatpush3.bf16.msra.mxu0 %v3634_v46  ;;  %v2771_v46 = vrot.slane %v2718_v14, %v2770_v45  ;;  %vm4515_vm13 = vmmov %vm4510_vm1 }
 0x6b5   : > { %3555 = vmatprep.subr.bf16.mxu0 %v3635_v16  ;;  %vm4516_vm7 = vmmov %vm4510_vm1 }
 0x6b6   : > { %vm4517_vm8 = vmmov %vm4510_vm1 }
 0x6b7   : > { %3550 = vmatmul.mubr.msk.bf16.vlgmr.msra.gmra.mxu1 %vm716_vm3, %v2189_v26  ;;  %v2764_v26 = vrot.slane %v2718_v14, %v2763_v55  ;;  %vm4512_vm3 = vmmov %vm4510_vm1 }
 0x6b8   : > { %3556 = vmatpush3.bf16.msra.mxu0 %v3635_v16 }
 0x72d   : > { %v2280_v40 = vpop.f32.mrf.mxu1 }
 0x72e   : > { %v2232_v29 = vpop.f32.mrf.mxu0 }
 0x72f   : > { %v3607_v41 = vpack.i.bf16 %v2280_v40, %v2232_v29  ;;  %v3515_v33 = vpop.f32.mrf.mxu1 }
 0x730   : > { %v3509_v36 = vpop.f32.mrf.mxu0 }
 0x731   : > { %3608 = vrot.lane.b32.xlu0 %v3607_v41, %s3719_s15  ;;  %v2283_v34 = vpop.f32.mrf.mxu1 }
 0x732   : > { %v2235_v60 = vpop.f32.mrf.mxu0 }
 0x733   : > { %v3516_v35 = vpop.f32.mrf.mxu1 }
 0x734   : > { %v3510_v24 = vpop.f32.mrf.mxu0 }
 0x736   : > { %v2328_v2 = vpop.f32.mrf.mxu0 }
 0x738   : > { %v3521_v13 = vpop.f32.mrf.mxu0 }
 0x73a   : > { %v2331_v9 = vpop.f32.mrf.mxu0  ;;  %v2376_v52 = vpop.f32.mrf.mxu1 }
 0x73b   : > { %v3612_v50 = vpack.i.bf16 %v2376_v52, %v2328_v2 }
 0x73c   : > { %v3522_v8 = vpop.f32.mrf.mxu0  ;;  %v3527_v49 = vpop.f32.mrf.mxu1 }
 0x73d   : > { %3613 = vrot.lane.b32.xlu1 %v3612_v50, %s3719_s15 }
 0x73e   : > { %v2379_v38 = vpop.f32.mrf.mxu1 }
 0x740   : > { %v3528_v43 = vpop.f32.mrf.mxu1 }
 0x76b   : > { %v2424_v23 = vpop.f32.mrf.mxu0 }
 0x76d   : > { %v3533_v30 = vpop.f32.mrf.mxu0 }
 0x76f   : > { %v2427_v42 = vpop.f32.mrf.mxu0  ;;  %v2472_v56 = vpop.f32.mrf.mxu1 }
 0x770   : > { %v3617_v44 = vpack.i.bf16 %v2472_v56, %v2424_v23 }
 0x771   : > { %v3534_v61 = vpop.f32.mrf.mxu0  ;;  %v3539_v62 = vpop.f32.mrf.mxu1 }
 0x772   : > { %3618 = vrot.lane.b32.xlu0 %v3617_v44, %s3719_s15  ;;  %v3188_v44 = vld [vmem:[%s4479_s7] ss:$0 sm:$0xff] }
 0x773   : > { %v2475_v15 = vpop.f32.mrf.mxu1  ;;  %v2520_v32 = vpop.f32.mrf.mxu0 }
 0x775   : > { %v3540_v31 = vpop.f32.mrf.mxu1  ;;  %v3545_v0 = vpop.f32.mrf.mxu0 }
 0x776   : > { %2724 = vbcast.lane.b32.xlu0 %v2722_v17, 256 }
 0x777   : > { %v2523_v63 = vpop.f32.mrf.mxu0  ;;  %v2568_v5 = vpop.f32.mrf.mxu1 }
 0x778   : > { %v3622_v7 = vpack.i.bf16 %v2568_v5, %v2520_v32 }
 0x779   : > { %v3546_v28 = vpop.f32.mrf.mxu0  ;;  %v3551_v3 = vpop.f32.mrf.mxu1 }
 0x77a   : > { %3623 = vrot.lane.b32.xlu1 %v3622_v7, %s3719_s15  ;;  %2738 = vbcast.lane.b32.xlu0 %v2736_v22, 256 }
 0x77b   : > { %v2571_v21 = vpop.f32.mrf.mxu1 }
 0x77d   : > { %v3552_v10 = vpop.f32.mrf.mxu1 }
 0x77e   : > { %2731 = vbcast.lane.b32.xlu1 %v2729_v58, 256  ;;  %2752 = vbcast.lane.b32.xlu0 %v2750_v48, 256 }
 0x782   : > { %2745 = vbcast.lane.b32.xlu1 %v2743_v47, 256  ;;  %2766 = vbcast.lane.b32.xlu0 %v2764_v26, 256 }
 0x786   : > { %2759 = vbcast.lane.b32.xlu1 %v2757_v12, 256 }
 0x78a   : > { %2773 = vbcast.lane.b32.xlu1 %v2771_v46, 256  ;;  %v3638_v46 = vld [vmem:[%s4482_s10 + $0x8] sm:$0xff]  }
 0x78b   : > { %3577 = vmatprep.subr.bf16.mxu0 %v3638_v46 }
 0x7a3   : > { %v3609_v40 = vpop.permute.xlu0 %3608 }
 0x7a4   : > { %v3611_v29 = vunpack.i.h.bf16 %v3609_v40  ;;  %v3610_v41 = vunpack.i.l.bf16 %v3609_v40  ;;  %v3639_v40 = vld [vmem:[%s4482_s10] sm:$0xff]  }
 0x7a6   : > { %v2607_v33 = vsel %vm500_vm0, %v4235_v19, %v3611_v29  ;;  %v2606_v36 = vsel %vm500_vm0, %v4233_v1, %v3610_v41 }
 0x7a7   : > { %v2614_v16 = vpack.c.bf16 %v2607_v33, %v2606_v36  ;;  %v3195_v33 = vld [vmem:[%s4481_s9] ss:$0 sm:$0xff] }
 0x7a9   : > { %3557 = vmatprep.mubr.msk.bf16.mxu0 %vm4510_vm1, %v2614_v16 }
 0x7af   : > { %v3614_v34 = vpop.permute.xlu1 %3613 }
 0x7b0   : > { %v3616_v60 = vunpack.i.h.bf16 %v3614_v34  ;;  %v3615_v35 = vunpack.i.l.bf16 %v3614_v34 }
 0x7b2   : > { %v2609_v24 = vsel %vm500_vm0, %v4239_v27, %v3616_v60  ;;  %v2608_v2 = vsel %vm500_vm0, %v4237_v4, %v3615_v35 }
 0x7b3   : > { %v2615_v13 = vpack.c.bf16 %v2609_v24, %v2608_v2 }
 0x7b5   : > { %3558 = vmatmul.mubr.msk.bf16.vlgmr.msra.gmra.mxu0 %vm4511_vm2, %v2615_v13  ;;  %vm4518_vm2 = vmmov %vm4510_vm1 }
 0x7b6   : > { %3578 = vmatpush3.bf16.msra.mxu0 %v3638_v46 }
 0x7b7   : > { %3579 = vmatprep.subr.bf16.mxu0 %v3639_v40 }
 0x7ba   : > { %3580 = vmatpush3.bf16.msra.mxu0 %v3639_v40 }
 0x7e4   : > { %v3619_v9 = vpop.permute.xlu0 %3618 }
 0x7e5   : > { %v3621_v19 = vunpack.i.h.bf16 %v3619_v9  ;;  %v3620_v52 = vunpack.i.l.bf16 %v3619_v9 }
 0x7e7   : > { %v2611_v1 = vsel %vm500_vm0, %v4243_v37, %v3621_v19  ;;  %v2610_v50 = vsel %vm500_vm0, %v4241_v59, %v3620_v52  ;;  %v3636_v37 = vld [vmem:[%s4480_s8 + $0x8] sm:$0xff]   ;;  %v3637_v59 = vld [vmem:[%s4480_s8] sm:$0xff]  }
 0x7e8   : > { %v2616_v8 = vpack.c.bf16 %v2611_v1, %v2610_v50  ;;  %3565 = vmatprep.subr.bf16.mxu1 %v3636_v37 }
 0x7e9   : > { %3566 = vmatpush3.bf16.msra.mxu1 %v3636_v37 }
 0x7ea   : > { %3561 = vmatprep.mubr.msk.bf16.mxu0 %vm4512_vm3, %v2616_v8  ;;  %3567 = vmatprep.subr.bf16.mxu1 %v3637_v59  ;;  %vm4519_vm3 = vmmov %vm4510_vm1 }
 0x7ec   : > { %v3624_v49 = vpop.permute.xlu1 %3623 }
 0x7ed   : > { %v3626_v27 = vunpack.i.h.bf16 %v3624_v49  ;;  %v3625_v38 = vunpack.i.l.bf16 %v3624_v49  ;;  %3568 = vmatpush3.bf16.msra.mxu1 %v3637_v59 }
 0x7ef   : > { %v2613_v4 = vsel %vm500_vm0, %v4245_v11, %v3626_v27  ;;  %v2612_v43 = vsel %vm500_vm0, %v4247_v18, %v3625_v38  ;;  %v2725_v11 = vpop.permute.xlu0 %2724 }
 0x7f0   : > { %v2617_v23 = vpack.c.bf16 %v2613_v4, %v2612_v43  ;;  %v2732_v30 = vpop.permute.xlu1 %2731  ;;  %vm2775_vm9 = vcmp.gt.f32.partialorder %v2725_v11, 0.5 }
 0x7f1   : > { %vm2776_vm10 = vcmp.gt.f32.partialorder %v2732_v30, 0.5 }
 0x7f2   : > { %3562 = vmatmul.mubr.msk.bf16.gmra.mxu0 %vm4513_vm4, %v2617_v23  ;;  %vm4520_vm4 = vmmov %vm4510_vm1 }
 0x7f3   : > { %v2739_v61 = vpop.permute.xlu0 %2738 }
 0x7f4   : > { %v2746_v18 = vpop.permute.xlu1 %2745  ;;  %vm2777_vm11 = vcmp.gt.f32.partialorder %v2739_v61, 0.5 }
 0x7f5   : > { %vm2778_vm0 = vcmp.gt.f32.partialorder %v2746_v18, 0.5  ;;  %v3202_v18 = vld [vmem:[%s4483_s11] ss:$0 sm:$0xff] }
 0x7f7   : > { %v2753_v14 = vpop.permute.xlu0 %2752 }
 0x7f8   : > { %v2760_v7 = vpop.permute.xlu1 %2759  ;;  %vm2779_vm15 = vcmp.gt.f32.partialorder %v2753_v14, 0.5 }
 0x7f9   : > { %vm2780_vm6 = vcmp.gt.f32.partialorder %v2760_v7, 0.5 }
 0x7fb   : > { %v2767_v58 = vpop.permute.xlu0 %2766 }
 0x7fc   : > { %v2774_v17 = vpop.permute.xlu1 %2773  ;;  %vm2781_vm5 = vcmp.gt.f32.partialorder %v2767_v58, 0.5 }
 0x7fd   : > { %vm2782_vm14 = vcmp.gt.f32.partialorder %v2774_v17, 0.5 }
 0x875   : > { %v3559_v42 = vpop.f32.mrf.mxu0 }
 0x876   : > { %v2696_v32 = vadd.f32 %v3559_v42, %v3188_v44 }
 0x877   : > { %v2687_v56 = vpop.f32.mrf.mxu0 }
 0x878   : > { %v2688_v57 = vadd.f32 %v3188_v44, %v2687_v56  ;;  %v2785_v63 = vsel %vm2777_vm11, 0.0, %v2696_v32 }
 0x879   : > { %v3560_v62 = vpop.f32.mrf.mxu0 }
 0x87a   : > { %v2699_v15 = vadd.f32 %v3560_v62, %v3188_v44  ;;  %v2783_v25 = vsel %vm2775_vm9, 0.0, %v2688_v57 }
 0x87b   : > { %v2690_v54 = vpop.f32.mrf.mxu0 }
 0x87c   : > { %v2691_v31 = vadd.f32 %v3188_v44, %v2690_v54  ;;  %v2786_v0 = vsel %vm2778_vm0, 0.0, %v2699_v15  ;;  %vm3039_vm0 = vcmask 781312  }
 0x87d   : > { %v2792_v6 = vpack.c.bf16 %v2786_v0, %v2785_v63 }
 0x87e   : > { %v2784_v39 = vsel %vm2776_vm10, 0.0, %v2691_v31 }
 0x87f   : > { %v2791_v5 = vpack.c.bf16 %v2784_v39, %v2783_v25 }
 0x881   : > { %3569 = vmatprep.mubr.msk.bf16.mxu1 %vm4514_vm12, %v2791_v5 }
 0x882   : > { %3570 = vmatmul.mubr.msk.bf16.vlgmr.msra.gmra.mxu1 %vm4515_vm13, %v2792_v6 }
 0x8b2   : > { %v3563_v28 = vpop.f32.mrf.mxu0 }
 0x8b3   : > { %v2712_v51 = vadd.f32 %v3563_v28, %v3188_v44 }
 0x8b4   : > { %v2703_v3 = vpop.f32.mrf.mxu0 }
 0x8b5   : > { %v2704_v21 = vadd.f32 %v3188_v44, %v2703_v3  ;;  %v2789_v12 = vsel %vm2781_vm5, 0.0, %v2712_v51 }
 0x8b6   : > { %v3564_v20 = vpop.f32.mrf.mxu0 }
 0x8b7   : > { %v2715_v22 = vadd.f32 %v3564_v20, %v3188_v44  ;;  %v2787_v48 = vsel %vm2779_vm15, 0.0, %v2704_v21 }
 0x8b8   : > { %v2706_v10 = vpop.f32.mrf.mxu0 }
 0x8b9   : > { %v2707_v47 = vadd.f32 %v3188_v44, %v2706_v10  ;;  %v2790_v53 = vsel %vm2782_vm14, 0.0, %v2715_v22 }
 0x8ba   : > { %v2794_v26 = vpack.c.bf16 %v2790_v53, %v2789_v12 }
 0x8bb   : > { %v2788_v55 = vsel %vm2780_vm6, 0.0, %v2707_v47 }
 0x8bc   : > { %v2793_v45 = vpack.c.bf16 %v2788_v55, %v2787_v48 }
 0x8be   : > { %3573 = vmatprep.mubr.msk.bf16.mxu1 %vm4516_vm7, %v2793_v45 }
 0x8bf   : > { %3574 = vmatmul.mubr.msk.bf16.gmra.mxu1 %vm4517_vm8, %v2794_v26 }
 0x942   : > { %v3571_v29 = vpop.f32.mrf.mxu1 }
 0x943   : > { %v2873_v60 = vadd.f32 %v3571_v29, %v3195_v33 }
 0x944   : > { %v2864_v41 = vpop.f32.mrf.mxu1 }
 0x945   : > { %v2865_v16 = vadd.f32 %v3195_v33, %v2864_v41  ;;  %v2897_v19 = vmax.f32 %v2873_v60, 0.0 }
 0x946   : > { %v3572_v36 = vpop.f32.mrf.mxu1 }
 0x947   : > { %v2876_v34 = vadd.f32 %v3572_v36, %v3195_v33  ;;  %v2895_v13 = vmax.f32 %v2865_v16, 0.0 }
 0x948   : > { %v2867_v35 = vpop.f32.mrf.mxu1 }
 0x949   : > { %v2868_v24 = vadd.f32 %v3195_v33, %v2867_v35  ;;  %v2898_v2 = vmax.f32 %v2876_v34, 0.0 }
 0x94b   : > { %v2896_v9 = vmax.f32 %v2868_v24, 0.0  ;;  %v2904_v1 = vpack.c.bf16 %v2898_v2, %v2897_v19 }
 0x94d   : > { %v2903_v52 = vpack.c.bf16 %v2896_v9, %v2895_v13 }
 0x94f   : > { %3581 = vmatprep.mubr.msk.bf16.mxu0 %vm4510_vm1, %v2903_v52 }
 0x950   : > { %3582 = vmatmul.mubr.msk.bf16.vlgmr.msra.gmra.mxu0 %vm4518_vm2, %v2904_v1 }
 0x97f   : > { %v3575_v50 = vpop.f32.mrf.mxu1 }
 0x980   : > { %v2889_v4 = vadd.f32 %v3575_v50, %v3195_v33 }
 0x981   : > { %v2880_v8 = vpop.f32.mrf.mxu1 }
 0x982   : > { %v2881_v27 = vadd.f32 %v3195_v33, %v2880_v8  ;;  %v2901_v11 = vmax.f32 %v2889_v4, 0.0 }
 0x983   : > { %v3576_v49 = vpop.f32.mrf.mxu1 }
 0x984   : > { %v2892_v38 = vadd.f32 %v3576_v49, %v3195_v33  ;;  %v2899_v59 = vmax.f32 %v2881_v27, 0.0 }
 0x985   : > { %v2883_v43 = vpop.f32.mrf.mxu1 }
 0x986   : > { %v2884_v23 = vadd.f32 %v3195_v33, %v2883_v43  ;;  %v2902_v37 = vmax.f32 %v2892_v38, 0.0 }
 0x988   : > { %v2900_v30 = vmax.f32 %v2884_v23, 0.0  ;;  %v2906_v56 = vpack.c.bf16 %v2902_v37, %v2901_v11 }
 0x98a   : > { %v2905_v42 = vpack.c.bf16 %v2900_v30, %v2899_v59 }
 0x98c   : > { %3585 = vmatprep.mubr.msk.bf16.mxu0 %vm4519_vm3, %v2905_v42 }
 0x98d   : > { %3586 = vmatmul.mubr.msk.bf16.gmra.mxu0 %vm4520_vm4, %v2906_v56 }
 0xa10   : > { %v3583_v44 = vpop.f32.mrf.mxu0 }
 0xa11   : > { %v2985_v61 = vadd.f32 %v3583_v44, %v3202_v18 }
 0xa12   : > { %v2976_v62 = vpop.f32.mrf.mxu0 }
 0xa13   : > { %v3221_v57 = vpack.c.bf16 %v2985_v61, %v2985_v61  ;;  %v2977_v15 = vadd.f32 %v3202_v18, %v2976_v62 }
 0xa14   : > { %v3584_v32 = vpop.f32.mrf.mxu0 }
 0xa15   : > { %3042 = vst.msk [vmem:[%s4451_s22 + $0x8] sm:$0xf] %vm3039_vm0, %v3221_v57  ;;  %v3219_v54 = vpack.c.bf16 %v2977_v15, %v2977_v15  ;;  %v2988_v31 = vadd.f32 %v3584_v32, %v3202_v18 }
 0xa16   : > { %v2979_v0 = vpop.f32.mrf.mxu0 }
 0xa17   : > { %3040 = vst.msk [vmem:[%s4451_s22] sm:$0xf] %vm3039_vm0, %v3219_v54  ;;  %v3222_v25 = vpack.c.bf16 %v2988_v31, %v2988_v31  ;;  %v2980_v39 = vadd.f32 %v3202_v18, %v2979_v0 }
 0xa19   : > { %3043 = vst.msk [vmem:[%s4451_s22 + $0xc] sm:$0xf] %vm3039_vm0, %v3222_v25  ;;  %v3220_v63 = vpack.c.bf16 %v2980_v39, %v2980_v39 }
 0xa1b   : > { %3041 = vst.msk [vmem:[%s4451_s22 + $0x4] sm:$0xf] %vm3039_vm0, %v3220_v63 }
 0xa4d   : > { %v3587_v5 = vpop.f32.mrf.mxu0 }
 0xa4e   : > { %v3001_v6 = vadd.f32 %v3587_v5, %v3202_v18 }
 0xa4f   : > { %v2992_v7 = vpop.f32.mrf.mxu0 }
 0xa50   : > { %v3225_v14 = vpack.c.bf16 %v3001_v6, %v3001_v6  ;;  %v2993_v28 = vadd.f32 %v3202_v18, %v2992_v7 }
 0xa51   : > { %v3588_v3 = vpop.f32.mrf.mxu0 }
 0xa52   : > { %3046 = vst.msk [vmem:[%s4451_s22 + $0x18] sm:$0xf] %vm3039_vm0, %v3225_v14  ;;  %v3223_v17 = vpack.c.bf16 %v2993_v28, %v2993_v28  ;;  %v3004_v58 = vadd.f32 %v3588_v3, %v3202_v18 }
 0xa53   : > { %v2995_v20 = vpop.f32.mrf.mxu0 }
 0xa54   : > { %3044 = vst.msk [vmem:[%s4451_s22 + $0x10] sm:$0xf] %vm3039_vm0, %v3223_v17  ;;  %v3226_v21 = vpack.c.bf16 %v3004_v58, %v3004_v58  ;;  %v2996_v22 = vadd.f32 %v3202_v18, %v2995_v20 }
 0xa56   : > { %3047 = vst.msk [vmem:[%s4451_s22 + $0x1c] sm:$0xf] %vm3039_vm0, %v3226_v21  ;;  %v3224_v51 = vpack.c.bf16 %v2996_v22, %v2996_v22 }
 0xa58   : > { %3045 = vst.msk [vmem:[%s4451_s22 + $0x14] sm:$0xf] %vm3039_vm0, %v3224_v51 }
 0xa59 PF: > { %s22_s21 = sadd.s32 1, %s3710_s21  }
 0xa5a   : > { %p19_p5 = scmp.ge.s32.totalorder %s22_s21, 4  }
 0xa5c   :  { %21 = sbr.rel (!%p19_p5) target bundleno = 1 (0x1), region = 104 }

</bundles_post_ra>
